<compile_context>
chip_gen: v5e
topology: v5e:2x2
jax: 0.10.0
libtpu: 0.0.40
codegen_flags: <defaults>
</compile_context>

<pallas_src>
import jax
import jax.numpy as jnp
from jax.experimental import pallas as pl
from jax.experimental.pallas import tpu as pltpu


def _round_up(x, m):
    return ((x + m - 1) // m) * m


def _make_kernel(N, T_pad, TILE_I, TILE_J):
    def kernel(x_ref, xi_ref, pos_ref,
               fc1_w, fc1_b, wqa, wka, wv,
               pw1, pb1, pw2, pb2, pw2a, ba1,
               aw2, ab2, fc2_w, fc2_b,
               out_ref, h_s, p1_s):
        it = pl.program_id(1)
        i0 = pl.multiple_of(it * TILE_I, TILE_I)

        # ---- per-batch shared projections (cheap: O(N*T^2)) ------------------
        xb = x_ref[0]                                    # (N, F_pad) f32
        posb = pos_ref[0]                                # (N, 3)     f32
        h = jnp.dot(xb.astype(jnp.bfloat16), fc1_w[...],
                    preferred_element_type=jnp.float32) + fc1_b[...]
        h_s[...] = h.astype(jnp.bfloat16)                # (N, T_pad) bf16
        p1_s[...] = jnp.dot(posb, pw1[...],
                            preferred_element_type=jnp.float32)       # (N, H)

        # ---- i-tile quantities ------------------------------------------------
        hi = h_s[pl.ds(i0, TILE_I), :]                                  # (TI, T_pad) bf16
        qa = jnp.dot(hi, wqa[...], preferred_element_type=jnp.float32)  # (TI, TE_pad)
        p1i = p1_s[pl.ds(i0, TILE_I), :] + pb1[...]                     # (TI, H)
        xi = xi_ref[0]                                                  # (TI, F_pad) residual

        num_j = N // TILE_J

        def j_body(jt, carry):
            m, l, acc = carry
            j0 = pl.multiple_of(jt * TILE_J, TILE_J)
            hj = h_s[pl.ds(j0, TILE_J), :]                              # (TJ, T_pad) bf16
            p1j = p1_s[pl.ds(j0, TILE_J), :]                            # (TJ, H)
            kaj = jnp.dot(hj, wka[...], preferred_element_type=jnp.float32)  # (TJ, TE_pad)
            vj = jnp.dot(hj, wv[...], preferred_element_type=jnp.float32)    # (TJ, T_pad)

            # positional-MLP hidden (factored first layer) + ReLU
            ph = jnp.maximum(p1i[:, None, :] - p1j[None, :, :], 0.0)    # (TI, TJ, H)
            phb = ph.astype(jnp.bfloat16)

            # positional embedding (second layer)
            pe = jnp.einsum('ijh,hd->ijd', phb, pw2[...],
                            preferred_element_type=jnp.float32) + pb2[...]   # (TI,TJ,T_pad)

            # attention-MLP hidden: first layer distributed over (q_i - k_j + pe)
            a_h = (qa[:, None, :] - kaj[None, :, :]
                   + jnp.einsum('ijh,he->ije', phb, pw2a[...],
                                preferred_element_type=jnp.float32)
                   + ba1[...])                                           # (TI,TJ,TE_pad)
            a_h = jnp.maximum(a_h, 0.0).astype(jnp.bfloat16)

            sim = jnp.einsum('ije,ed->ijd', a_h, aw2[...],
                             preferred_element_type=jnp.float32) + ab2[...]  # (TI,TJ,T_pad)

            vv = vj[None, :, :] + pe                                     # (TI,TJ,T_pad)

            # online softmax over j (independent per (i, channel))
            m_new = jnp.maximum(m, jnp.max(sim, axis=1))                 # (TI, T_pad)
            scale = jnp.exp(m - m_new)
            p = jnp.exp(sim - m_new[:, None, :])
            l_new = l * scale + jnp.sum(p, axis=1)
            acc_new = acc * scale + jnp.sum(p * vv, axis=1)
            return m_new, l_new, acc_new

        m0 = jnp.full((TILE_I, T_pad), -jnp.inf, dtype=jnp.float32)
        l0 = jnp.zeros((TILE_I, T_pad), dtype=jnp.float32)
        a0 = jnp.zeros((TILE_I, T_pad), dtype=jnp.float32)
        m, l, acc = jax.lax.fori_loop(0, num_j, j_body, (m0, l0, a0))

        agg = acc * pl.reciprocal(l, approx=True)                        # (TI, T_pad)
        out = (jnp.dot(agg.astype(jnp.bfloat16), fc2_w[...],
                       preferred_element_type=jnp.float32)
               + fc2_b[...] + xi)
        out_ref[0] = out.astype(out_ref.dtype)

    return kernel


def transformer_block(x, pos, params, *, tile_i=None, tile_j=None):
    B, N, F = x.shape
    T = params['fc1_w'].shape[1]
    H = params['pw1'].shape[1]
    TE = params['aw1'].shape[1]

    F_pad = _round_up(F, 128)
    T_pad = _round_up(T, 128)
    TE_pad = _round_up(TE, 128)

    # Tile sizes: keep per-step (TILE_I, TILE_J, max(T_pad, TE_pad)) intermediates well
    # under the ~32-48 MiB scoped-VMEM budget (v7x only has 64 MiB of VMEM per core).
    TILE_I = tile_i if tile_i is not None else min(N, 64)
    TILE_J = tile_j if tile_j is not None else min(N, 64)
    assert N % TILE_I == 0 and N % TILE_J == 0, "N must be a multiple of the tile sizes"
    # TODO(synk): masked tail handling for N not divisible by the tile size.

    f32 = jnp.float32
    bf16 = jnp.bfloat16

    def pad2(a, rows, cols):
        a = a.astype(f32)
        return jnp.pad(a, ((0, rows - a.shape[0]), (0, cols - a.shape[1])))

    # ---- fused + zero-padded weights (constant algebra done once, outside kernel) ----
    fc1_w = pad2(params['fc1_w'], F_pad, T_pad).astype(bf16)
    fc1_b = pad2(params['fc1_b'], 1, T_pad)
    wqa = pad2(params['wq'] @ params['aw1'], T_pad, TE_pad).astype(bf16)    # wq . aw1
    wka = pad2(params['wk'] @ params['aw1'], T_pad, TE_pad).astype(bf16)    # wk . aw1
    wv = pad2(params['wv'], T_pad, T_pad).astype(bf16)
    pw1 = params['pw1'].astype(f32)                                         # (3, H)
    pb1 = params['pb1'].astype(f32)                                         # (1, H)
    pw2 = pad2(params['pw2'], H, T_pad).astype(bf16)
    pb2 = pad2(params['pb2'], 1, T_pad)
    pw2a = pad2(params['pw2'] @ params['aw1'], H, TE_pad).astype(bf16)      # pw2 . aw1
    ba1 = pad2(params['pb2'] @ params['aw1'] + params['ab1'], 1, TE_pad)    # pb2.aw1 + ab1
    aw2 = pad2(params['aw2'], TE_pad, T_pad).astype(bf16)
    ab2 = pad2(params['ab2'], 1, T_pad)
    fc2_w = pad2(params['fc2_w'], T_pad, F_pad).astype(bf16)
    fc2_b = pad2(params['fc2_b'], 1, F_pad)

    x_p = jnp.pad(x.astype(f32), ((0, 0), (0, 0), (0, F_pad - F)))
    pos = pos.astype(f32)

    weights = [fc1_w, fc1_b, wqa, wka, wv, pw1, pb1, pw2, pb2, pw2a, ba1,
               aw2, ab2, fc2_w, fc2_b]

    kernel = _make_kernel(N, T_pad, TILE_I, TILE_J)
    grid = (B, N // TILE_I)

    in_specs = [
        pl.BlockSpec((1, N, F_pad), lambda b, it: (b, 0, 0)),        # x, all rows (k/v side)
        pl.BlockSpec((1, TILE_I, F_pad), lambda b, it: (b, it, 0)),  # x, i-tile rows (residual)
        pl.BlockSpec((1, N, 3), lambda b, it: (b, 0, 0)),            # pos, all rows
    ] + [pl.BlockSpec(w.shape, lambda b, it: (0, 0)) for w in weights]
    out_specs = pl.BlockSpec((1, TILE_I, F_pad), lambda b, it: (b, it, 0))

    out_padded = pl.pallas_call(
        kernel,
        out_shape=jax.ShapeDtypeStruct((B, N, F_pad), jnp.float32),
        grid_spec=pltpu.PrefetchScalarGridSpec(
            num_scalar_prefetch=0,
            grid=grid,
            in_specs=in_specs,
            out_specs=out_specs,
            scratch_shapes=[
                pltpu.VMEM((N, T_pad), bf16),   # h = fc1(x), shared across i/j tiles
                pltpu.VMEM((N, H), f32),        # pos @ pw1
            ],
        ),
        compiler_params=pltpu.CompilerParams(
            dimension_semantics=("parallel", "parallel"),
            vmem_limit_bytes=48 * 1024 * 1024,
        ),
    )(x_p, x_p, pos, *weights)

    return out_padded[..., :F]


def reference_block(x, pos, p):
    """Pure-JAX f32 reference mirroring the PyTorch forward (mask=None, k=None)."""
    h = x @ p['fc1_w'] + p['fc1_b']
    q = h @ p['wq']
    k = h @ p['wk']
    v = h @ p['wv']
    qk_rel = q[:, :, None, :] - k[:, None, :, :]
    rel_pos = pos[:, :, None, :] - pos[:, None, :, :]
    pe = jnp.maximum(rel_pos @ p['pw1'] + p['pb1'], 0.0) @ p['pw2'] + p['pb2']
    vv = v[:, None, :, :] + pe
    sim = jnp.maximum((qk_rel + pe) @ p['aw1'] + p['ab1'], 0.0) @ p['aw2'] + p['ab2']
    attn = jax.nn.softmax(sim, axis=-2)
    agg = jnp.sum(attn * vv, axis=-2)
    return agg @ p['fc2_w'] + p['fc2_b'] + x


def init_params(key, fdim, tdim, emb_hidden, attn_expansion):
    ks = jax.random.split(key, 16)

    def w(k, shape, scale):
        return jax.random.normal(k, shape, jnp.float32) * scale

    return {
        'fc1_w': w(ks[0], (fdim, tdim), 0.1),
        'fc1_b': w(ks[1], (1, tdim), 0.05),
        'wq':    w(ks[2], (tdim, tdim), 0.1),
        'wk':    w(ks[3], (tdim, tdim), 0.1),
        'wv':    w(ks[4], (tdim, tdim), 0.1),
        'pw1':   w(ks[5], (3, emb_hidden), 0.2),
        'pb1':   w(ks[6], (1, emb_hidden), 0.05),
        'pw2':   w(ks[7], (emb_hidden, tdim), 0.1),
        'pb2':   w(ks[8], (1, tdim), 0.05),
        'aw1':   w(ks[9], (tdim, tdim * attn_expansion), 0.1),
        'ab1':   w(ks[10], (1, tdim * attn_expansion), 0.05),
        'aw2':   w(ks[11], (tdim * attn_expansion, tdim), 0.1),
        'ab2':   w(ks[12], (1, tdim), 0.05),
        'fc2_w': w(ks[13], (tdim, fdim), 0.1),
        'fc2_b': w(ks[14], (1, fdim), 0.05),
    }


if __name__ == "__main__":
    B, N, FDIM = 2, 8, 16
    TDIM, EMB_HIDDEN, ATTN_EXP = 32, 16, 4
    # num_neighbors (k) = None, mask = None -> full dense attention path.
    # TODO(synk): top-k neighbor selection / mask branch not implemented (k=None path only).

    key = jax.random.PRNGKey(0)
    kx, kp, kparam = jax.random.split(key, 3)
    x = jax.random.normal(kx, (B, N, FDIM), jnp.float32)
    pos = jax.random.normal(kp, (B, N, 3), jnp.float32)
    params = init_params(kparam, FDIM, TDIM, EMB_HIDDEN, ATTN_EXP)

    out = transformer_block(x, pos, params)
    out = jax.block_until_ready(out)

    ref = reference_block(x, pos, params)
    assert out.shape == (B, N, FDIM)
    # bf16 MXU operands + approx reciprocal -> compare against the f32 reference with a
    # correspondingly loosened tolerance.
    assert jnp.allclose(out, ref, atol=2e-2, rtol=2e-2), "mismatch vs reference"

    print("KERNEL_OK")
</pallas_src>

<mosaic_0001>
module attributes {stable_mosaic.version = 11 : i64} {
  func.func @kernel(%arg0: i32, %arg1: i32, %arg2: memref<1x8x128xf32, #tpu.memory_space<vmem>>, %arg3: memref<1x8x128xf32, #tpu.memory_space<vmem>>, %arg4: memref<1x8x3xf32, #tpu.memory_space<vmem>>, %arg5: memref<128x128xbf16, #tpu.memory_space<vmem>>, %arg6: memref<1x128xf32, #tpu.memory_space<vmem>>, %arg7: memref<128x128xbf16, #tpu.memory_space<vmem>>, %arg8: memref<128x128xbf16, #tpu.memory_space<vmem>>, %arg9: memref<128x128xbf16, #tpu.memory_space<vmem>>, %arg10: memref<3x16xf32, #tpu.memory_space<vmem>>, %arg11: memref<1x16xf32, #tpu.memory_space<vmem>>, %arg12: memref<16x128xbf16, #tpu.memory_space<vmem>>, %arg13: memref<1x128xf32, #tpu.memory_space<vmem>>, %arg14: memref<16x128xbf16, #tpu.memory_space<vmem>>, %arg15: memref<1x128xf32, #tpu.memory_space<vmem>>, %arg16: memref<128x128xbf16, #tpu.memory_space<vmem>>, %arg17: memref<1x128xf32, #tpu.memory_space<vmem>>, %arg18: memref<128x128xbf16, #tpu.memory_space<vmem>>, %arg19: memref<1x128xf32, #tpu.memory_space<vmem>>, %arg20: memref<1x8x128xf32, #tpu.memory_space<vmem>>, %arg21: memref<8x128xbf16, #tpu.memory_space<vmem>>, %arg22: memref<8x16xf32, #tpu.memory_space<vmem>>) attributes {dimension_semantics = [#tpu.dimension_semantics<parallel>, #tpu.dimension_semantics<parallel>], iteration_bounds = array<i64: 2, 1>, scalar_prefetch = 0 : i64, scratch_operands = 2 : i64, tpu.core_type = #tpu.core_type<tc>, window_params = [{transform_indices = @transform_0, window_bounds = array<i64: 1, 8, 128>}, {transform_indices = @transform_1, window_bounds = array<i64: 1, 8, 128>}, {transform_indices = @transform_2, window_bounds = array<i64: 1, 8, 3>}, {pipeline_mode = #tpu.pipeline_mode<synchronous>, transform_indices = @transform_3, window_bounds = array<i64: 128, 128>}, {pipeline_mode = #tpu.pipeline_mode<synchronous>, transform_indices = @transform_4, window_bounds = array<i64: 1, 128>}, {pipeline_mode = #tpu.pipeline_mode<synchronous>, transform_indices = @transform_5, window_bounds = array<i64: 128, 128>}, {pipeline_mode = #tpu.pipeline_mode<synchronous>, transform_indices = @transform_6, window_bounds = array<i64: 128, 128>}, {pipeline_mode = #tpu.pipeline_mode<synchronous>, transform_indices = @transform_7, window_bounds = array<i64: 128, 128>}, {pipeline_mode = #tpu.pipeline_mode<synchronous>, transform_indices = @transform_8, window_bounds = array<i64: 3, 16>}, {pipeline_mode = #tpu.pipeline_mode<synchronous>, transform_indices = @transform_9, window_bounds = array<i64: 1, 16>}, {pipeline_mode = #tpu.pipeline_mode<synchronous>, transform_indices = @transform_10, window_bounds = array<i64: 16, 128>}, {pipeline_mode = #tpu.pipeline_mode<synchronous>, transform_indices = @transform_11, window_bounds = array<i64: 1, 128>}, {pipeline_mode = #tpu.pipeline_mode<synchronous>, transform_indices = @transform_12, window_bounds = array<i64: 16, 128>}, {pipeline_mode = #tpu.pipeline_mode<synchronous>, transform_indices = @transform_13, window_bounds = array<i64: 1, 128>}, {pipeline_mode = #tpu.pipeline_mode<synchronous>, transform_indices = @transform_14, window_bounds = array<i64: 128, 128>}, {pipeline_mode = #tpu.pipeline_mode<synchronous>, transform_indices = @transform_15, window_bounds = array<i64: 1, 128>}, {pipeline_mode = #tpu.pipeline_mode<synchronous>, transform_indices = @transform_16, window_bounds = array<i64: 128, 128>}, {pipeline_mode = #tpu.pipeline_mode<synchronous>, transform_indices = @transform_17, window_bounds = array<i64: 1, 128>}, {transform_indices = @transform_18, window_bounds = array<i64: 1, 8, 128>}]} {
    %c8_i32 = arith.constant 8 : i32
    %0 = arith.muli %arg1, %c8_i32 : i32
    %1 = tpu.assume_multiple %0, 8 : i32
    %c0 = arith.constant 0 : index
    %c0_0 = arith.constant 0 : index
    %c0_1 = arith.constant 0 : index
    %2 = vector.load %arg2[%c0, %c0_0, %c0_1] : memref<1x8x128xf32, #tpu.memory_space<vmem>>, vector<1x8x128xf32>
    %3 = vector.shape_cast %2 : vector<1x8x128xf32> to vector<8x128xf32>
    %c0_2 = arith.constant 0 : index
    %c0_3 = arith.constant 0 : index
    %c0_4 = arith.constant 0 : index
    %4 = vector.load %arg4[%c0_2, %c0_3, %c0_4] : memref<1x8x3xf32, #tpu.memory_space<vmem>>, vector<1x8x3xf32>
    %5 = vector.shape_cast %4 : vector<1x8x3xf32> to vector<8x3xf32>
    %6 = arith.truncf %3 : vector<8x128xf32> to vector<8x128xbf16>
    %c0_5 = arith.constant 0 : index
    %c0_6 = arith.constant 0 : index
    %7 = vector.load %arg5[%c0_5, %c0_6] : memref<128x128xbf16, #tpu.memory_space<vmem>>, vector<128x128xbf16>
    %cst = arith.constant dense<0.000000e+00> : vector<8x128xf32>
    %8 = tpu.matmul %6, %7, %cst {dimension_numbers = #tpu.dot_dimension_numbers<[1], [0], [0], [1], [0, 0, 1, 1], [], []>} : vector<8x128xbf16>, vector<128x128xbf16>, vector<8x128xf32> -> vector<8x128xf32>
    %c0_7 = arith.constant 0 : index
    %c0_8 = arith.constant 0 : index
    %9 = vector.load %arg6[%c0_7, %c0_8] : memref<1x128xf32, #tpu.memory_space<vmem>>, vector<1x128xf32>
    %10 = vector.broadcast %9 : vector<1x128xf32> to vector<8x128xf32>
    %11 = arith.addf %8, %10 : vector<8x128xf32>
    %12 = arith.truncf %11 : vector<8x128xf32> to vector<8x128xbf16>
    %c0_9 = arith.constant 0 : index
    %c0_10 = arith.constant 0 : index
    %13 = vector.load %arg21[%c0_9, %c0_10] : memref<8x128xbf16, #tpu.memory_space<vmem>>, vector<8x128xbf16>
    tpu.vector_store %arg21[%c0_9, %c0_10], %12 {strides = array<i32>} : memref<8x128xbf16, #tpu.memory_space<vmem>>, vector<8x128xbf16>,
    %c0_11 = arith.constant 0 : index
    %c0_12 = arith.constant 0 : index
    %14 = vector.load %arg10[%c0_11, %c0_12] : memref<3x16xf32, #tpu.memory_space<vmem>>, vector<3x16xf32>
    %cst_13 = arith.constant dense<0.000000e+00> : vector<8x16xf32>
    %15 = tpu.matmul %5, %14, %cst_13 {dimension_numbers = #tpu.dot_dimension_numbers<[1], [0], [0], [1], [0, 0, 1, 1], [], []>} : vector<8x3xf32>, vector<3x16xf32>, vector<8x16xf32> -> vector<8x16xf32>
    %c0_14 = arith.constant 0 : index
    %c0_15 = arith.constant 0 : index
    %16 = vector.load %arg22[%c0_14, %c0_15] : memref<8x16xf32, #tpu.memory_space<vmem>>, vector<8x16xf32>
    tpu.vector_store %arg22[%c0_14, %c0_15], %15 {strides = array<i32>} : memref<8x16xf32, #tpu.memory_space<vmem>>, vector<8x16xf32>,
    %17 = arith.index_cast %1 : i32 to index
    %c0_16 = arith.constant 0 : index
    %18 = vector.load %arg21[%17, %c0_16] : memref<8x128xbf16, #tpu.memory_space<vmem>>, vector<8x128xbf16>
    %c0_17 = arith.constant 0 : index
    %c0_18 = arith.constant 0 : index
    %19 = vector.load %arg7[%c0_17, %c0_18] : memref<128x128xbf16, #tpu.memory_space<vmem>>, vector<128x128xbf16>
    %cst_19 = arith.constant dense<0.000000e+00> : vector<8x128xf32>
    %20 = tpu.matmul %18, %19, %cst_19 {dimension_numbers = #tpu.dot_dimension_numbers<[1], [0], [0], [1], [0, 0, 1, 1], [], []>} : vector<8x128xbf16>, vector<128x128xbf16>, vector<8x128xf32> -> vector<8x128xf32>
    %21 = arith.index_cast %1 : i32 to index
    %c0_20 = arith.constant 0 : index
    %22 = vector.load %arg22[%21, %c0_20] : memref<8x16xf32, #tpu.memory_space<vmem>>, vector<8x16xf32>
    %c0_21 = arith.constant 0 : index
    %c0_22 = arith.constant 0 : index
    %23 = vector.load %arg11[%c0_21, %c0_22] : memref<1x16xf32, #tpu.memory_space<vmem>>, vector<1x16xf32>
    %24 = vector.broadcast %23 : vector<1x16xf32> to vector<8x16xf32>
    %25 = arith.addf %22, %24 : vector<8x16xf32>
    %c0_23 = arith.constant 0 : index
    %c0_24 = arith.constant 0 : index
    %c0_25 = arith.constant 0 : index
    %26 = vector.load %arg3[%c0_23, %c0_24, %c0_25] : memref<1x8x128xf32, #tpu.memory_space<vmem>>, vector<1x8x128xf32>
    %27 = vector.shape_cast %26 : vector<1x8x128xf32> to vector<8x128xf32>
    %cst_26 = arith.constant 0xFF800000 : f32
    %28 = vector.broadcast %cst_26 : f32 to vector<8x128xf32>
    %cst_27 = arith.constant 0.000000e+00 : f32
    %29 = vector.broadcast %cst_27 : f32 to vector<8x128xf32>
    %cst_28 = arith.constant 0.000000e+00 : f32
    %30 = vector.broadcast %cst_28 : f32 to vector<8x128xf32>
    %c0_i32 = arith.constant 0 : i32
    %c8_i32_29 = arith.constant 8 : i32
    %31 = arith.muli %c0_i32, %c8_i32_29 : i32
    %32 = tpu.assume_multiple %31, 8 : i32
    %33 = arith.index_cast %32 : i32 to index
    %c0_30 = arith.constant 0 : index
    %34 = vector.load %arg21[%33, %c0_30] : memref<8x128xbf16, #tpu.memory_space<vmem>>, vector<8x128xbf16>
    %35 = arith.index_cast %32 : i32 to index
    %c0_31 = arith.constant 0 : index
    %36 = vector.load %arg22[%35, %c0_31] : memref<8x16xf32, #tpu.memory_space<vmem>>, vector<8x16xf32>
    %c0_32 = arith.constant 0 : index
    %c0_33 = arith.constant 0 : index
    %37 = vector.load %arg8[%c0_32, %c0_33] : memref<128x128xbf16, #tpu.memory_space<vmem>>, vector<128x128xbf16>
    %cst_34 = arith.constant dense<0.000000e+00> : vector<8x128xf32>
    %38 = tpu.matmul %34, %37, %cst_34 {dimension_numbers = #tpu.dot_dimension_numbers<[1], [0], [0], [1], [0, 0, 1, 1], [], []>} : vector<8x128xbf16>, vector<128x128xbf16>, vector<8x128xf32> -> vector<8x128xf32>
    %c0_35 = arith.constant 0 : index
    %c0_36 = arith.constant 0 : index
    %39 = vector.load %arg9[%c0_35, %c0_36] : memref<128x128xbf16, #tpu.memory_space<vmem>>, vector<128x128xbf16>
    %cst_37 = arith.constant dense<0.000000e+00> : vector<8x128xf32>
    %40 = tpu.matmul %34, %39, %cst_37 {dimension_numbers = #tpu.dot_dimension_numbers<[1], [0], [0], [1], [0, 0, 1, 1], [], []>} : vector<8x128xbf16>, vector<128x128xbf16>, vector<8x128xf32> -> vector<8x128xf32>
    %41 = vector.shape_cast %25 : vector<8x16xf32> to vector<8x1x16xf32>
    %42 = vector.shape_cast %36 : vector<8x16xf32> to vector<1x8x16xf32>
    %43 = vector.broadcast %41 : vector<8x1x16xf32> to vector<8x8x16xf32>
    %44 = vector.broadcast %42 : vector<1x8x16xf32> to vector<8x8x16xf32>
    %45 = arith.subf %43, %44 : vector<8x8x16xf32>
    %cst_38 = arith.constant 0.000000e+00 : f32
    %46 = vector.broadcast %cst_38 : f32 to vector<8x8x16xf32>
    %47 = arith.maximumf %45, %46 : vector<8x8x16xf32>
    %48 = arith.truncf %47 : vector<8x8x16xf32> to vector<8x8x16xbf16>
    %c0_39 = arith.constant 0 : index
    %c0_40 = arith.constant 0 : index
    %49 = vector.load %arg12[%c0_39, %c0_40] : memref<16x128xbf16, #tpu.memory_space<vmem>>, vector<16x128xbf16>
    "tpu.trace_start"() <{level = 10 : i32, message = "ijh,hd->ijd"}> : () -> ()
    %cst_41 = arith.constant dense<0.000000e+00> : vector<8x8x128xf32>
    %50 = tpu.matmul %48, %49, %cst_41 {dimension_numbers = #tpu.dot_dimension_numbers<[2], [0], [0, 1], [1], [0, 0, 0, 1, 1, 1], [], []>} : vector<8x8x16xbf16>, vector<16x128xbf16>, vector<8x8x128xf32> -> vector<8x8x128xf32>
    "tpu.trace_stop"() : () -> ()
    %c0_42 = arith.constant 0 : index
    %c0_43 = arith.constant 0 : index
    %51 = vector.load %arg13[%c0_42, %c0_43] : memref<1x128xf32, #tpu.memory_space<vmem>>, vector<1x128xf32>
    %52 = vector.shape_cast %51 : vector<1x128xf32> to vector<1x1x128xf32>
    %53 = vector.broadcast %52 : vector<1x1x128xf32> to vector<8x8x128xf32>
    %54 = arith.addf %50, %53 : vector<8x8x128xf32>
    %55 = vector.shape_cast %20 : vector<8x128xf32> to vector<8x1x128xf32>
    %56 = vector.shape_cast %38 : vector<8x128xf32> to vector<1x8x128xf32>
    %57 = vector.broadcast %55 : vector<8x1x128xf32> to vector<8x8x128xf32>
    %58 = vector.broadcast %56 : vector<1x8x128xf32> to vector<8x8x128xf32>
    %59 = arith.subf %57, %58 : vector<8x8x128xf32>
    %c0_44 = arith.constant 0 : index
    %c0_45 = arith.constant 0 : index
    %60 = vector.load %arg14[%c0_44, %c0_45] : memref<16x128xbf16, #tpu.memory_space<vmem>>, vector<16x128xbf16>
    "tpu.trace_start"() <{level = 10 : i32, message = "ijh,he->ije"}> : () -> ()
    %cst_46 = arith.constant dense<0.000000e+00> : vector<8x8x128xf32>
    %61 = tpu.matmul %48, %60, %cst_46 {dimension_numbers = #tpu.dot_dimension_numbers<[2], [0], [0, 1], [1], [0, 0, 0, 1, 1, 1], [], []>} : vector<8x8x16xbf16>, vector<16x128xbf16>, vector<8x8x128xf32> -> vector<8x8x128xf32>
    "tpu.trace_stop"() : () -> ()
    %62 = arith.addf %59, %61 : vector<8x8x128xf32>
    %c0_47 = arith.constant 0 : index
    %c0_48 = arith.constant 0 : index
    %63 = vector.load %arg15[%c0_47, %c0_48] : memref<1x128xf32, #tpu.memory_space<vmem>>, vector<1x128xf32>
    %64 = vector.shape_cast %63 : vector<1x128xf32> to vector<1x1x128xf32>
    %65 = vector.broadcast %64 : vector<1x1x128xf32> to vector<8x8x128xf32>
    %66 = arith.addf %62, %65 : vector<8x8x128xf32>
    %cst_49 = arith.constant 0.000000e+00 : f32
    %67 = vector.broadcast %cst_49 : f32 to vector<8x8x128xf32>
    %68 = arith.maximumf %66, %67 : vector<8x8x128xf32>
    %69 = arith.truncf %68 : vector<8x8x128xf32> to vector<8x8x128xbf16>
    %c0_50 = arith.constant 0 : index
    %c0_51 = arith.constant 0 : index
    %70 = vector.load %arg16[%c0_50, %c0_51] : memref<128x128xbf16, #tpu.memory_space<vmem>>, vector<128x128xbf16>
    "tpu.trace_start"() <{level = 10 : i32, message = "ije,ed->ijd"}> : () -> ()
    %cst_52 = arith.constant dense<0.000000e+00> : vector<8x8x128xf32>
    %71 = tpu.matmul %69, %70, %cst_52 {dimension_numbers = #tpu.dot_dimension_numbers<[2], [0], [0, 1], [1], [0, 0, 0, 1, 1, 1], [], []>} : vector<8x8x128xbf16>, vector<128x128xbf16>, vector<8x8x128xf32> -> vector<8x8x128xf32>
    "tpu.trace_stop"() : () -> ()
    %c0_53 = arith.constant 0 : index
    %c0_54 = arith.constant 0 : index
    %72 = vector.load %arg17[%c0_53, %c0_54] : memref<1x128xf32, #tpu.memory_space<vmem>>, vector<1x128xf32>
    %73 = vector.shape_cast %72 : vector<1x128xf32> to vector<1x1x128xf32>
    %74 = vector.broadcast %73 : vector<1x1x128xf32> to vector<8x8x128xf32>
    %75 = arith.addf %71, %74 : vector<8x8x128xf32>
    %76 = vector.shape_cast %40 : vector<8x128xf32> to vector<1x8x128xf32>
    %77 = vector.broadcast %76 : vector<1x8x128xf32> to vector<8x8x128xf32>
    %78 = arith.addf %77, %54 : vector<8x8x128xf32>
    %cst_55 = arith.constant dense<0xFF800000> : vector<8x128xf32>
    %79 = vector.multi_reduction <maximumf>, %75, %cst_55 [1] : vector<8x8x128xf32> to vector<8x128xf32>
    %80 = arith.maximumf %28, %79 : vector<8x128xf32>
    %81 = arith.subf %28, %80 : vector<8x128xf32>
    %82 = math.exp %81 : vector<8x128xf32>
    %83 = vector.shape_cast %80 : vector<8x128xf32> to vector<8x1x128xf32>
    %84 = vector.broadcast %83 : vector<8x1x128xf32> to vector<8x8x128xf32>
    %85 = arith.subf %75, %84 : vector<8x8x128xf32>
    %86 = math.exp %85 : vector<8x8x128xf32>
    %87 = arith.mulf %29, %82 : vector<8x128xf32>
    %cst_56 = arith.constant dense<0.000000e+00> : vector<8x128xf32>
    %88 = vector.multi_reduction <add>, %86, %cst_56 [1] : vector<8x8x128xf32> to vector<8x128xf32>
    %89 = arith.addf %87, %88 : vector<8x128xf32>
    %90 = arith.mulf %30, %82 : vector<8x128xf32>
    %91 = arith.mulf %86, %78 : vector<8x8x128xf32>
    %cst_57 = arith.constant dense<0.000000e+00> : vector<8x128xf32>
    %92 = vector.multi_reduction <add>, %91, %cst_57 [1] : vector<8x8x128xf32> to vector<8x128xf32>
    %93 = arith.addf %90, %92 : vector<8x128xf32>
    %c1_i32 = arith.constant 1 : i32
    %94 = tpu.reciprocal %89 {approx = true} : vector<8x128xf32> -> vector<8x128xf32>
    %95 = arith.mulf %93, %94 : vector<8x128xf32>
    %96 = arith.truncf %95 : vector<8x128xf32> to vector<8x128xbf16>
    %c0_58 = arith.constant 0 : index
    %c0_59 = arith.constant 0 : index
    %97 = vector.load %arg18[%c0_58, %c0_59] : memref<128x128xbf16, #tpu.memory_space<vmem>>, vector<128x128xbf16>
    %cst_60 = arith.constant dense<0.000000e+00> : vector<8x128xf32>
    %98 = tpu.matmul %96, %97, %cst_60 {dimension_numbers = #tpu.dot_dimension_numbers<[1], [0], [0], [1], [0, 0, 1, 1], [], []>} : vector<8x128xbf16>, vector<128x128xbf16>, vector<8x128xf32> -> vector<8x128xf32>
    %c0_61 = arith.constant 0 : index
    %c0_62 = arith.constant 0 : index
    %99 = vector.load %arg19[%c0_61, %c0_62] : memref<1x128xf32, #tpu.memory_space<vmem>>, vector<1x128xf32>
    %100 = vector.broadcast %99 : vector<1x128xf32> to vector<8x128xf32>
    %101 = arith.addf %98, %100 : vector<8x128xf32>
    %102 = arith.addf %101, %27 : vector<8x128xf32>
    %c0_63 = arith.constant 0 : index
    %c0_64 = arith.constant 0 : index
    %c0_65 = arith.constant 0 : index
    %103 = vector.load %arg20[%c0_63, %c0_64, %c0_65] : memref<1x8x128xf32, #tpu.memory_space<vmem>>, vector<1x8x128xf32>
    %104 = vector.shape_cast %103 : vector<1x8x128xf32> to vector<8x128xf32>
    %105 = vector.shape_cast %102 : vector<8x128xf32> to vector<1x8x128xf32>
    tpu.vector_store %arg20[%c0_63, %c0_64, %c0_65], %105 {strides = array<i32>} : memref<1x8x128xf32, #tpu.memory_space<vmem>>, vector<1x8x128xf32>,
    return
  }
  func.func @transform_0(%arg0: i32, %arg1: i32) -> (i32, i32, i32) {
    %c0_i32 = arith.constant 0 : i32
    %c0_i32_0 = arith.constant 0 : i32
    %c0_i32_1 = arith.constant 0 : i32
    return %arg0, %c0_i32, %c0_i32_0 : i32, i32, i32
  }
  func.func @transform_1(%arg0: i32, %arg1: i32) -> (i32, i32, i32) {
    %c0_i32 = arith.constant 0 : i32
    %c0_i32_0 = arith.constant 0 : i32
    return %arg0, %arg1, %c0_i32 : i32, i32, i32
  }
  func.func @transform_2(%arg0: i32, %arg1: i32) -> (i32, i32, i32) {
    %c0_i32 = arith.constant 0 : i32
    %c0_i32_0 = arith.constant 0 : i32
    %c0_i32_1 = arith.constant 0 : i32
    return %arg0, %c0_i32, %c0_i32_0 : i32, i32, i32
  }
  func.func @transform_3(%arg0: i32, %arg1: i32) -> (i32, i32) {
    %c0_i32 = arith.constant 0 : i32
    %c0_i32_0 = arith.constant 0 : i32
    %c0_i32_1 = arith.constant 0 : i32
    return %c0_i32, %c0_i32_0 : i32, i32
  }
  func.func @transform_4(%arg0: i32, %arg1: i32) -> (i32, i32) {
    %c0_i32 = arith.constant 0 : i32
    %c0_i32_0 = arith.constant 0 : i32
    %c0_i32_1 = arith.constant 0 : i32
    return %c0_i32, %c0_i32_0 : i32, i32
  }
  func.func @transform_5(%arg0: i32, %arg1: i32) -> (i32, i32) {
    %c0_i32 = arith.constant 0 : i32
    %c0_i32_0 = arith.constant 0 : i32
    %c0_i32_1 = arith.constant 0 : i32
    return %c0_i32, %c0_i32_0 : i32, i32
  }
  func.func @transform_6(%arg0: i32, %arg1: i32) -> (i32, i32) {
    %c0_i32 = arith.constant 0 : i32
    %c0_i32_0 = arith.constant 0 : i32
    %c0_i32_1 = arith.constant 0 : i32
    return %c0_i32, %c0_i32_0 : i32, i32
  }
  func.func @transform_7(%arg0: i32, %arg1: i32) -> (i32, i32) {
    %c0_i32 = arith.constant 0 : i32
    %c0_i32_0 = arith.constant 0 : i32
    %c0_i32_1 = arith.constant 0 : i32
    return %c0_i32, %c0_i32_0 : i32, i32
  }
  func.func @transform_8(%arg0: i32, %arg1: i32) -> (i32, i32) {
    %c0_i32 = arith.constant 0 : i32
    %c0_i32_0 = arith.constant 0 : i32
    %c0_i32_1 = arith.constant 0 : i32
    return %c0_i32, %c0_i32_0 : i32, i32
  }
  func.func @transform_9(%arg0: i32, %arg1: i32) -> (i32, i32) {
    %c0_i32 = arith.constant 0 : i32
    %c0_i32_0 = arith.constant 0 : i32
    %c0_i32_1 = arith.constant 0 : i32
    return %c0_i32, %c0_i32_0 : i32, i32
  }
  func.func @transform_10(%arg0: i32, %arg1: i32) -> (i32, i32) {
    %c0_i32 = arith.constant 0 : i32
    %c0_i32_0 = arith.constant 0 : i32
    %c0_i32_1 = arith.constant 0 : i32
    return %c0_i32, %c0_i32_0 : i32, i32
  }
  func.func @transform_11(%arg0: i32, %arg1: i32) -> (i32, i32) {
    %c0_i32 = arith.constant 0 : i32
    %c0_i32_0 = arith.constant 0 : i32
    %c0_i32_1 = arith.constant 0 : i32
    return %c0_i32, %c0_i32_0 : i32, i32
  }
  func.func @transform_12(%arg0: i32, %arg1: i32) -> (i32, i32) {
    %c0_i32 = arith.constant 0 : i32
    %c0_i32_0 = arith.constant 0 : i32
    %c0_i32_1 = arith.constant 0 : i32
    return %c0_i32, %c0_i32_0 : i32, i32
  }
  func.func @transform_13(%arg0: i32, %arg1: i32) -> (i32, i32) {
    %c0_i32 = arith.constant 0 : i32
    %c0_i32_0 = arith.constant 0 : i32
    %c0_i32_1 = arith.constant 0 : i32
    return %c0_i32, %c0_i32_0 : i32, i32
  }
  func.func @transform_14(%arg0: i32, %arg1: i32) -> (i32, i32) {
    %c0_i32 = arith.constant 0 : i32
    %c0_i32_0 = arith.constant 0 : i32
    %c0_i32_1 = arith.constant 0 : i32
    return %c0_i32, %c0_i32_0 : i32, i32
  }
  func.func @transform_15(%arg0: i32, %arg1: i32) -> (i32, i32) {
    %c0_i32 = arith.constant 0 : i32
    %c0_i32_0 = arith.constant 0 : i32
    %c0_i32_1 = arith.constant 0 : i32
    return %c0_i32, %c0_i32_0 : i32, i32
  }
  func.func @transform_16(%arg0: i32, %arg1: i32) -> (i32, i32) {
    %c0_i32 = arith.constant 0 : i32
    %c0_i32_0 = arith.constant 0 : i32
    %c0_i32_1 = arith.constant 0 : i32
    return %c0_i32, %c0_i32_0 : i32, i32
  }
  func.func @transform_17(%arg0: i32, %arg1: i32) -> (i32, i32) {
    %c0_i32 = arith.constant 0 : i32
    %c0_i32_0 = arith.constant 0 : i32
    %c0_i32_1 = arith.constant 0 : i32
    return %c0_i32, %c0_i32_0 : i32, i32
  }
  func.func @transform_18(%arg0: i32, %arg1: i32) -> (i32, i32, i32) {
    %c0_i32 = arith.constant 0 : i32
    %c0_i32_0 = arith.constant 0 : i32
    return %arg0, %arg1, %c0_i32 : i32, i32, i32
  }
}

</mosaic_0001>

<bundles_post_ra>
// kernel: tpu_custom_call.1
= control target key start
LH: loop header
LB: loop body
LE: loop exit
PB: predicated region body
PF: predicated region fallthrough
CT: control target
= control target key end

     0   :  { %s3558_s0 = inlined_call_operand.vmem [shape: f32[2,8,128], index: 0, kind: input, shape index: {}]   ;;  %s3559_s1 = inlined_call_operand.hbm [shape: f32[2,8,128], index: 1, kind: input, shape index: {}]   ;;  %s3560_s2 = inlined_call_operand.vmem [shape: f32[2,8,3], index: 2, kind: input, shape index: {}]   ;;  %s3561_s3 = inlined_call_operand.hbm [shape: bf16[128,128], index: 3, kind: input, shape index: {}]   ;;  %s3562_s4 = inlined_call_operand.hbm [shape: f32[1,128], index: 4, kind: input, shape index: {}]   ;;  %s3563_s5 = inlined_call_operand.hbm [shape: bf16[128,128], index: 5, kind: input, shape index: {}]   ;;  %s3564_s6 = inlined_call_operand.hbm [shape: bf16[128,128], index: 6, kind: input, shape index: {}]   ;;  %s3565_s7 = inlined_call_operand.hbm [shape: bf16[128,128], index: 7, kind: input, shape index: {}]   ;;  %s3566_s8 = inlined_call_operand.hbm [shape: f32[3,16], index: 8, kind: input, shape index: {}]   ;;  %s3567_s9 = inlined_call_operand.hbm [shape: f32[1,16], index: 9, kind: input, shape index: {}]   ;;  %s3568_s10 = inlined_call_operand.vmem [shape: bf16[16,128], index: 10, kind: input, shape index: {}]   ;;  %s3569_s11 = inlined_call_operand.hbm [shape: f32[1,128], index: 11, kind: input, shape index: {}]   ;;  %s3570_s12 = inlined_call_operand.vmem [shape: bf16[16,128], index: 12, kind: input, shape index: {}]   ;;  %s3571_s13 = inlined_call_operand.vmem [shape: f32[1,128], index: 13, kind: input, shape index: {}]   ;;  %s3572_s14 = inlined_call_operand.hbm [shape: bf16[128,128], index: 14, kind: input, shape index: {}]   ;;  %s3573_s15 = inlined_call_operand.vmem [shape: f32[1,128], index: 15, kind: input, shape index: {}]   ;;  %s3574_s16 = inlined_call_operand.hbm [shape: bf16[128,128], index: 16, kind: input, shape index: {}]   ;;  %s3575_s17 = inlined_call_operand.vmem [shape: f32[1,128], index: 17, kind: input, shape index: {}]   ;;  %s3576_s18 = inlined_call_operand.hbm [shape: f32[2,8,128], index: 18, kind: output, shape index: {}]  }
   0x1   :  { %3579 = sst [smem:[#allocation30_spill]] %s3558_s0 }
   0x2   :  { %3580 = sst [smem:[#allocation31_spill]] %s3559_s1 }
   0x3   :  { %3581 = sst [smem:[#allocation32_spill]] %s3560_s2 }
   0x4   :  { %3582 = sst [smem:[#allocation33_spill]] %s3561_s3 }
   0x5   :  { %3583 = sst [smem:[#allocation34_spill]] %s3562_s4 }
   0x6   :  { %3584 = sst [smem:[#allocation35_spill]] %s3563_s5 }
   0x7   :  { %3585 = sst [smem:[#allocation36_spill]] %s3565_s7 }
   0x8   :  { %3586 = sst [smem:[#allocation37_spill]] %s3568_s10 }
   0x9   :  { %3587 = sst [smem:[#allocation38_spill]] %s3570_s12 }
   0xa   :  { %3588 = sst [smem:[#allocation39_spill]] %s3571_s13 }
   0xb   :  { %3589 = sst [smem:[#allocation40_spill]] %s3573_s15 }
   0xc   :  { %3590 = sst [smem:[#allocation41_spill]] %s3575_s17 }
   0xd   :  { %3591 = sst [smem:[#allocation42_spill]] %s3576_s18 }
   0xe   :  { %23 = vsyncpa [#allocation5], 0 }
   0xf   :  { %25 = vsyncpa [#allocation5 + $0x1], 0 }
  0x10   :  { %26 = vsyncpa [#allocation8], 0 }
  0x11   :  { %27 = vsyncpa [#allocation11], 0 }
  0x12   :  { %28 = vsyncpa [#allocation14], 0 }
  0x13   :  { %29 = vsyncpa [#allocation17], 0 }
  0x14   :  { %30 = vsyncpa [#allocation20], 0 }
  0x15   :  { %31 = vsyncpa [#allocation6], 0 }
  0x16   :  { %33 = vsyncpa [#allocation6 + $0x1], 0  ;;  %s3159_s27 = smov 0   ;;  %s3161_s28 = smov 0  }
  0x17   :  { %s3163_s29 = smov 0   ;;  %s3165_s30 = smov 0  }
  0x18   :  { %s3167_s0 = smov 0   ;;  %s3169_s19 = smov 0  }
  0x19 LB: > { %s3577_s1 = sadd.s32 4294967295, %s3050_s19   ;;  %p2106_p0 = scmp.ge.s32.totalorder %s3050_s19, 1  ;;  %s3050_s19 = sphi %s3169_s19, %s39_s19   ;;  %s3046_s0 = sphi %s3167_s0, %s3616_s0   ;;  %s3042_s30 = sphi %s3165_s30, %s3615_s30   ;;  %s3038_s29 = sphi %s3163_s29, %s3614_s29   ;;  %s3034_s28 = sphi %s3161_s28, %s3613_s28   ;;  %s3030_s27 = sphi %s3159_s27, %s3612_s27  }
  0x1a   : > { %p3193_p1 = scmp.eq.s32.totalorder %s3577_s1, 0  ;;  %p479_p2 = scmp.lt.s32.totalorder %s3050_s19, 3 }
  0x1b   : > { %s3593_s3 = sld [smem:[#allocation33_spill]]  ;;  %s3052_s24 = smov [#allocation7]  }
  0x1c   : > { %p3201_p3 = pnand %p2106_p0, %p479_p2  ;;  %s492_s25 = sshll.u32 %s3052_s24, 4  ;;  %s493_s25 = int_to_ptr.vmem [resolvable:$true] %s492_s25 }
  0x1d   : > { %p2117_p6 = scmp.ge.s32.totalorder %s3050_s19, 2  ;;  %s3596_s5 = sld [smem:[#allocation35_spill]] }
  0x1e   : > { %p2443_p4 = pneg %p3201_p3  ;;  %s3054_s18 = smov 4  }
  0x1f   : > { %s3055_s24 = smov [#allocation10]   ;;  %s3597_s7 = sld [smem:[#allocation36_spill]] }
  0x20   : > { %p3209_p5 = pnand %p2443_p4, %p3193_p1  ;;  %s518_s17 = sshll.u32 %s3055_s24, 4  ;;  %s519_s17 = int_to_ptr.vmem [resolvable:$true] %s518_s17 }
  0x21   : > { %s490_s2 = sshll.u32 %s3593_s3, 4  ;;  %s3053_s3 = smov 64   ;;  %s491_s2 = int_to_ptr.hbm [resolvable:$true] %s490_s2 }
  0x22   : > { %2446 = dma.hbm_to_vmem [thread:$0]  (!%p3209_p5), %s491_s2, 1024, %s493_s25, [#allocation8], %s3053_s3, %s3053_s3, %s3054_s18  }
  0x23   : > { %s516_s1 = sshll.u32 %s3596_s5, 4  ;;  %s571_s5 = sshll.u32 %s3567_s9, 4  ;;  %s517_s1 = int_to_ptr.hbm [resolvable:$true] %s516_s1  ;;  %s572_s5 = int_to_ptr.hbm [resolvable:$true] %s571_s5 }
  0x24   : > { %2452 = dma.hbm_to_vmem [thread:$0]  (!%p3209_p5), %s517_s1, 1024, %s519_s17, [#allocation11], %s3053_s3, %s3053_s3, %s3054_s18  }
  0x25   : > { %s544_s12 = sshll.u32 %s3597_s7, 4  ;;  %s3056_s10 = smov [#allocation13]   ;;  %s545_s12 = int_to_ptr.hbm [resolvable:$true] %s544_s12 }
  0x26   : > { %s546_s2 = sshll.u32 %s3056_s10, 4  ;;  %s3057_s13 = smov [#allocation16]   ;;  %s547_s2 = int_to_ptr.vmem [resolvable:$true] %s546_s2 }
  0x27   : > { %2458 = dma.hbm_to_vmem [thread:$0]  (!%p3209_p5), %s545_s12, 1024, %s547_s2, [#allocation14], %s3053_s3, %s3053_s3, %s3054_s18  }
  0x28   : > { %s573_s15 = sshll.u32 %s3057_s13, 4  ;;  %s603_s17 = sshll.u32 %s3572_s14, 4  ;;  %s574_s15 = int_to_ptr.vmem [resolvable:$true] %s573_s15  ;;  %s604_s17 = int_to_ptr.hbm [resolvable:$true] %s603_s17 }
  0x29   : > { %2464 = dma.hbm_to_vmem [thread:$0]  (!%p3209_p5), %s572_s5, 16, %s574_s15, [#allocation17]  }
  0x2a   : > { %s3598_s4 = sld [smem:[#allocation34_spill]]  ;;  %s3058_s22 = smov [#allocation19]  }
  0x2b   : > { %s605_s7 = sshll.u32 %s3058_s22, 4  ;;  %s3059_s12 = smov [#allocation9]   ;;  %s606_s7 = int_to_ptr.vmem [resolvable:$true] %s605_s7 }
  0x2c   : > { %2470 = dma.hbm_to_vmem [thread:$0]  (!%p3209_p5), %s604_s17, 1024, %s606_s7, [#allocation20], %s3053_s3, %s3053_s3, %s3054_s18  }
  0x2d   : > { %s507_s2 = sshll.u32 %s3059_s12, 4  ;;  %s530_s5 = sshll.u32 %s3564_s6, 4  ;;  %s508_s2 = int_to_ptr.vmem [resolvable:$true] %s507_s2  ;;  %s531_s5 = int_to_ptr.hbm [resolvable:$true] %s530_s5 }
  0x2e   : > { %s559_s1 = sshll.u32 %s3566_s8, 4  ;;  %s3060_s10 = smov [#allocation12]   ;;  %s560_s1 = int_to_ptr.hbm [resolvable:$true] %s559_s1 }
  0x2f   : > { %s532_s22 = sshll.u32 %s3060_s10, 4  ;;  %s3061_s7 = smov [#allocation15]   ;;  %s533_s22 = int_to_ptr.vmem [resolvable:$true] %s532_s22 }
  0x30   : > { %s505_s21 = sshll.u32 %s3598_s4, 4  ;;  %s561_s17 = sshll.u32 %s3061_s7, 4  ;;  %s506_s21 = int_to_ptr.hbm [resolvable:$true] %s505_s21  ;;  %s562_s17 = int_to_ptr.vmem [resolvable:$true] %s561_s17 }
  0x31   : > { %2449 = dma.hbm_to_vmem [thread:$0]  (!%p3209_p5), %s506_s21, 16, %s508_s2, [#allocation8]  }
  0x32   : > { %2455 = dma.hbm_to_vmem [thread:$0]  (!%p3209_p5), %s531_s5, 1024, %s533_s22, [#allocation11], %s3053_s3, %s3053_s3, %s3054_s18  }
  0x33   : > { %s586_s2 = sshll.u32 %s3569_s11, 4  ;;  %s620_s5 = sshll.u32 %s3574_s16, 4  ;;  %s587_s2 = int_to_ptr.hbm [resolvable:$true] %s586_s2  ;;  %s621_s5 = int_to_ptr.hbm [resolvable:$true] %s620_s5 }
  0x34   : > { %2461 = dma.hbm_to_vmem [thread:$0]  (!%p3209_p5), %s560_s1, 64, %s562_s17, [#allocation14]  }
  0x35   : > { %s3062_s15 = smov [#allocation18]   ;;  %s3063_s10 = smov [#allocation21]  }
  0x36   : > { %s588_s24 = sshll.u32 %s3062_s15, 4  ;;  %s622_s22 = sshll.u32 %s3063_s10, 4  ;;  %s589_s24 = int_to_ptr.vmem [resolvable:$true] %s588_s24  ;;  %s623_s22 = int_to_ptr.vmem [resolvable:$true] %s622_s22 }
  0x37   : > { %2467 = dma.hbm_to_vmem [thread:$0]  (!%p3209_p5), %s587_s2, 16, %s589_s24, [#allocation17]  }
  0x38   : > { %2473 = dma.hbm_to_vmem [thread:$0]  (!%p3209_p5), %s621_s5, 1024, %s623_s22, [#allocation20], %s3053_s3, %s3053_s3, %s3054_s18  }
  0x39   : > { %s51_s1 = sadd.s32 1, %s3046_s0  ;;  %s2105_s7 = sadd.s32 4294967294, %s3050_s19  }
  0x3a   : > { %p53_p7 = scmp.ge.s32.totalorder %s51_s1, 2  ;;  %s86_s17 = sadd.s32 1, %s3038_s29 }
  0x3b   : > { %p93_p8 = scmp.ne.s32.totalorder %s3038_s29, %s3034_s28  ;;  %p94_p9 = scmp.eq.s32.totalorder %s3050_s19, 0 }
  0x3c   : > { %s3618_s1 = smov (%p53_p7, %s51_s1), 0  ;;  %p99_p10 = scmp.ne.s32.totalorder %s3034_s28, %s3030_s27 }
  0x3d   : > { %s81_s12 = ssub.s32 %s3046_s0, %s3618_s1  ;;  %s3599_s26 = sadd.s32 4294967295, %s3050_s19  }
  0x3e   : > { %p466_p11 = scmp.eq.s32.totalorder %s3599_s26, 1  ;;  %p84_p12 = scmp.eq.s32.totalorder %s81_s12, 0 }
  0x3f   : > { %p3295_p13 = por %p3193_p1, %p99_p10  ;;  %p472_p2 = scmp.eq.s32.totalorder %s2105_s7, 1 }
  0x40   : > { %p3299_p0 = por %p466_p11, %p93_p8  ;;  %p95_p4 = por %p94_p9, %p93_p8 }
  0x41   : > { %s3304_s21 = scalar_select %p84_p12, %s3038_s29, %s86_s17  }
  0x42   : > { %p3306_p5 = por %p472_p2, %p99_p10  ;;  %s646_s13 = sand.u32 1, %s3038_s29  }
  0x43   : > { %s2119_s25 = sshll.u32 %s3046_s0, 3  ;;  %p2492_p7 = scmp.lt.s32.totalorder %s3050_s19, 2 }
  0x44   : > { %s2118_s5 = sshll.u32 %s646_s13, 3  ;;  %s3603_s10 = sld [smem:[#allocation31_spill]] }
  0x45   : > { %s650_s26 = scalar_lea.vmem [#allocation4], %s2118_s5  ;;  %p2475_p11 = pnand %p2492_p7, %p95_p4 }
  0x46   : > { %s659_s4 = sshll.u32 %s650_s26, 4  ;;  %s647_s7 = scalar_lea.sflag [#allocation5], %s646_s13  ;;  %s660_s4 = int_to_ptr.vmem [resolvable:$true] %s659_s4 }
  0x47   : > { %s3319_s17 = sand.u32 (!%p3201_p3), 1, %s3034_s28  }
  0x48   : > { %675 = sbr.rel (%p3201_p3) target bundleno = 804 (0x324), region = 92  ;;  %s2121_s15 = sshll.u32 (!%p3201_p3), %s3319_s17, 3 }
  0x49   : > { %s3325_s5 = scalar_lea.vmem (!%p3201_p3), [#allocation4], %s2121_s15 }
  0x4a   : > { %s655_s22 = scalar_lea.hbm %s3603_s10, %s2119_s25  ;;  %s678_s25 = scalar_lea.sflag (!%p3201_p3), [#allocation5], %s3319_s17 }
  0x4b   : > { %s657_s12 = sshll.u32 %s655_s22, 4  ;;  %s658_s12 = int_to_ptr.hbm [resolvable:$true] %s657_s12 }
  0x4c   : > { %2477 = dma.hbm_to_vmem [thread:$0]  (!%p2475_p11), %s658_s12, 128, %s660_s4, %s647_s7  }
  0x4d   : > { %3001 = dma.done.wait (%p3295_p13), %s678_s25, 128  }
  0x4e   : > { %3003 = vsyncadd (%p3295_p13), %s678_s25, 4294967168 }
  0x4f   : > { %3005 = dma.done.wait (%p3193_p1), [#allocation8], 1040  }
  0x50   : > { %3007 = vsyncadd (%p3193_p1), [#allocation8], 4294966256 }
  0x51   : > { %3009 = dma.done.wait (%p3193_p1), [#allocation11], 2048  }
  0x52   : > { %3011 = vsyncadd (%p3193_p1), [#allocation11], 4294965248 }
  0x53   : > { %3013 = dma.done.wait (%p3193_p1), [#allocation14], 1088  }
  0x54   : > { %3015 = vsyncadd (%p3193_p1), [#allocation14], 4294966208 }
  0x55   : > { %3017 = dma.done.wait (%p3193_p1), [#allocation17], 32  }
  0x56   : > { %3019 = vsyncadd (%p3193_p1), [#allocation17], 4294967264 }
  0x57   : > { %3021 = dma.done.wait (%p3193_p1), [#allocation20], 2048  }
  0x58   : > { %3023 = vsyncadd (%p3193_p1), [#allocation20], 4294965248  ;;  %p793_p3 = scmp.lt.s32.totalorder %s3042_s30, 1  ;;  %vm894_vm0 = vcmask 1042432   ;;  %s3604_s24 = sld [smem:[#allocation32_spill]]  ;;  %vm890_vm1 = vcmask 23552  }
  0x59   : > { %v889_v0 = vld [vmem:[#allocation15] sm:$0x7]  ;;  %v2356_v2 = vld [vmem:[#allocation7 + $0x38] sm:$0xff]  ;;  %v2355_v3 = vld [vmem:[#allocation7 + $0x30] sm:$0xff]  ;;  %s3605_s12 = sld [smem:[#allocation30_spill]]  ;;  %vm918_vm2 = vcmask 130048  }
  0x5a   : > { %s794_s4 = scalar_select %p793_p3, %s3042_s30, 1  ;;  %2167 = vmatpush.msk.msra.mxu3 %vm894_vm0, %v889_v0  ;;  %874 = vmatpush.bf16.msra.mxu0 %v2356_v2  ;;  %v2372_v4 = vld [vmem:[#allocation12 + $0x38] sm:$0xff]  ;;  %v2371_v5 = vld [vmem:[#allocation12 + $0x30] sm:$0xff]  ;;  %v2354_v6 = vld [vmem:[#allocation7 + $0x28] sm:$0xff]  ;;  %vm1805_vm3 = vcmask 1041409   ;;  %vm1807_vm4 = vcmask 1042434  }
  0x5b   : > { %1076 = vmatpush.bf16.msra.mxu1 %v2372_v4  ;;  %v2353_v7 = vld [vmem:[#allocation7 + $0x20] sm:$0xff]  ;;  %v2352_v8 = vld [vmem:[#allocation7 + $0x18] sm:$0xff]  ;;  %v2351_v9 = vld [vmem:[#allocation7 + $0x10] sm:$0xff]  ;;  %s3607_s13 = sld [smem:[#allocation38_spill]]  ;;  %vm1809_vm5 = vcmask 1043459   ;;  %vm1811_vm6 = vcmask 1044484  }
  0x5c   : > { %s2133_s23 = sshll.u32 %s794_s4, 3  ;;  %v2350_v10 = vld [vmem:[#allocation7 + $0x8] sm:$0xff]  ;;  %v2349_v11 = vld [vmem:[#allocation7] sm:$0xff]  ;;  %v2363_v18 = vld [vmem:[#allocation10 + $0x30] sm:$0xff]  ;;  %s3606_s4 = sld [smem:[#allocation37_spill]]  ;;  %vm1813_vm7 = vcmask 1045509  }
  0x5d   : > { %v2370_v14 = vld [vmem:[#allocation12 + $0x28] sm:$0xff]  ;;  %v2369_v15 = vld [vmem:[#allocation12 + $0x20] sm:$0xff]  ;;  %v2364_v16 = vld [vmem:[#allocation10 + $0x38] sm:$0xff]  ;;  %s3608_s20 = sld [smem:[#allocation39_spill]]  ;;  %vm1815_vm8 = vcmask 1046534   ;;  %vm1817_vm9 = vcmask 1047559  }
  0x5e   : > { %s800_s10 = scalar_lea.vmem %s3604_s24, %s2133_s23  ;;  %875 = vmatpush.bf16.msra.mxu0 %v2355_v3  ;;  %989 = vmatpush.bf16.msra.mxu2 %v2364_v16  ;;  %v2368_v17 = vld [vmem:[#allocation12 + $0x18] sm:$0xff]  ;;  %v2367_v19 = vld [vmem:[#allocation12 + $0x10] sm:$0xff]  ;;  %v2362_v21 = vld [vmem:[#allocation10 + $0x28] sm:$0xff]  ;;  %s2346_s7 = sshll.u32 %s3042_s30, 3 }
  0x5f   : > { %v804_v1 = vld [vmem:[%s800_s10] sm:$0xff]  ;;  %1077 = vmatpush.bf16.msra.mxu1 %v2371_v5  ;;  %s796_s26 = scalar_lea.vmem %s3605_s12, %s2133_s23  ;;  %v2360_v25 = vld [vmem:[#allocation10 + $0x18] sm:$0xff]  ;;  %v2359_v27 = vld [vmem:[#allocation10 + $0x10] sm:$0xff]  ;;  %s3610_s23 = sld [smem:[#allocation41_spill]] }
  0x60   : > { %2168 = vmatmul.msk.f32.vlgmr.msra.gmra.mxu3 %vm890_vm1, %v804_v1  ;;  %v803_v12 = vld [vmem:[%s796_s26] sm:$0xff]  ;;  %v2380_v26 = vld [vmem:[#allocation13 + $0x38] sm:$0xff]  ;;  %v2379_v28 = vld [vmem:[#allocation13 + $0x30] sm:$0xff]  ;;  %s3609_s26 = sld [smem:[#allocation40_spill]]  ;;  %s1885_s30 = scalar_lea.sflag [#allocation6], %s3319_s17 }
  0x61   : > { %v805_v13 = vpack.c.bf16 %v803_v12, %v803_v12  ;;  %v2366_v22 = vld [vmem:[#allocation12 + $0x8] sm:$0xff]  ;;  %v2361_v23 = vld [vmem:[#allocation10 + $0x20] sm:$0xff]  ;;  %v2376_v35 = vld [vmem:[#allocation13 + $0x18] sm:$0xff]  ;;  %s3611_s24 = sld [smem:[#allocation42_spill]] }
  0x62   : > { %876 = vmatpush.bf16.msra.mxu0 %v2354_v6  ;;  %v2381_v20 = vld [vmem:[%s3606_s4] sm:$0xff]  ;;  %990 = vmatpush.bf16.msra.mxu2 %v2363_v18  ;;  %v2375_v39 = vld [vmem:[#allocation13 + $0x10] sm:$0xff]  ;;  %v2565_v59 = vld [vmem:[#allocation9] ss:$0 sm:$0xff] }
  0x63   : > { %1078 = vmatpush.bf16.msra.mxu1 %v2370_v14  ;;  %v2365_v24 = vld [vmem:[#allocation12] sm:$0xff]  ;;  %v2358_v29 = vld [vmem:[#allocation10 + $0x8] sm:$0xff] }
  0x64   : > { %v2378_v30 = vld [vmem:[#allocation13 + $0x28] sm:$0xff]  ;;  %v2357_v32 = vld [vmem:[#allocation10] sm:$0xff] }
  0x65   : > { %v2377_v33 = vld [vmem:[#allocation13 + $0x20] sm:$0xff]  ;;  %v2374_v42 = vld [vmem:[#allocation13 + $0x8] sm:$0xff] }
  0x66   : > { %877 = vmatpush.bf16.msra.mxu0 %v2353_v7  ;;  %991 = vmatpush.bf16.msra.mxu2 %v2362_v21  ;;  %v2564_v34 = vld [vmem:[#allocation16] ss:$0 sm:$0xff] }
  0x67   : > { %1079 = vmatpush.bf16.msra.mxu1 %v2369_v15  ;;  %v2382_v36 = vld [vmem:[%s3607_s13] sm:$0xff]  ;;  %s1896_s10 = scalar_lea.hbm %s3611_s24, %s2346_s7  ;;  %s2968_s4 = scalar_lea.hbm %s3611_s24, 16 }
  0x68   : > { %v2373_v49 = vld [vmem:[#allocation13] sm:$0xff]  ;;  %s1900_s12 = sshll.u32 %s1896_s10, 4  ;;  %s1901_s12 = int_to_ptr.hbm [resolvable:$true] %s1900_s12 }
  0x6a   : > { %878 = vmatpush.bf16.msra.mxu0 %v2352_v8  ;;  %992 = vmatpush.bf16.msra.mxu2 %v2361_v23 }
  0x6b   : > { %1080 = vmatpush.bf16.msra.mxu1 %v2368_v17 }
  0x6e   : > { %879 = vmatpush.bf16.msra.mxu0 %v2351_v9  ;;  %993 = vmatpush.bf16.msra.mxu2 %v2360_v25 }
  0x6f   : > { %1081 = vmatpush.bf16.msra.mxu1 %v2367_v19 }
  0x72   : > { %880 = vmatpush.bf16.msra.mxu0 %v2350_v10  ;;  %994 = vmatpush.bf16.msra.mxu2 %v2359_v27 }
  0x73   : > { %1082 = vmatpush.bf16.msra.mxu1 %v2366_v22 }
  0x76   : > { %881 = vmatpush.bf16.msra.mxu0 %v2349_v11  ;;  %995 = vmatpush.bf16.msra.mxu2 %v2358_v29 }
  0x77   : > { %1083 = vmatpush.bf16.msra.mxu1 %v2365_v24 }
  0x79   : > { %882 = vmatmul.bf16.vlgmr.msra.gmra.mxu0 %v805_v13 }
  0x7a   : > { %1265 = vmatpush.bf16.msrb.mxu0 %v2381_v20  ;;  %996 = vmatpush.bf16.msra.mxu2 %v2357_v32 }
  0x7b   : > { %1153 = vmatpush.bf16.msrb.mxu1 %v2380_v26 }
  0x7e   : > { %1334 = vmatpush.bf16.msrb.mxu2 %v2382_v36  ;;  %v2390_v36 = vld [vmem:[#allocation19 + $0x38] sm:$0xff] }
  0x7f   : > { %1154 = vmatpush.bf16.msrb.mxu1 %v2379_v28  ;;  %1484 = vmatpush.bf16.msrb.mxu3 %v2390_v36 }
  0x83   : > { %1155 = vmatpush.bf16.msrb.mxu1 %v2378_v30 }
  0x87   : > { %1156 = vmatpush.bf16.msrb.mxu1 %v2377_v33 }
  0x8b   : > { %1157 = vmatpush.bf16.msrb.mxu1 %v2376_v35 }
  0x8f   : > { %1158 = vmatpush.bf16.msrb.mxu1 %v2375_v39  ;;  %v2387_v39 = vld [vmem:[#allocation19 + $0x20] sm:$0xff] }
  0x93   : > { %1159 = vmatpush.bf16.msrb.mxu1 %v2374_v42 }
  0x97   : > { %1160 = vmatpush.bf16.msrb.mxu1 %v2373_v49 }
  0xe3   : > { %v915_v31 = vpop.f32.mrf.mxu3 }
  0xe4   : > { %919 = vst.msk [vmem:[#allocation3] sm:$0xff] %vm918_vm2, %v915_v31 }
  0xeb   : > { %v3366_v37 = vld [vmem:[#allocation3] sm:$0xff] }
  0xec   : > { %v1008_v38 = vadd.f32 %v2564_v34, %v3366_v37 }
  0xee   : > { %v1167_v40 = vrot.slane %v1008_v38, 1  ;;  %v1174_v41 = vperm.slane %v1008_v38, 0  ;;  %v1168_v45 = vrot.slane %v1008_v38, 2  ;;  %v1169_v46 = vrot.slane %v1008_v38, 3 }
  0xef   : > { %v1170_v4 = vrot.slane %v1008_v38, 4  ;;  %v1171_v5 = vrot.slane %v1008_v38, 5  ;;  %v1172_v20 = vrot.slane %v1008_v38, 6  ;;  %v1173_v21 = vrot.slane %v1008_v38, 7  ;;  %v2388_v38 = vld [vmem:[#allocation19 + $0x28] sm:$0xff] }
  0xf0   : > { %v1175_v43 = vperm.slane %v1167_v40, 0  ;;  %v1190_v44 = vsub.f32 %v1174_v41, %v3366_v37  ;;  %v1176_v52 = vperm.slane %v1168_v45, 0  ;;  %v1177_v53 = vperm.slane %v1169_v46, 0  ;;  %v2386_v40 = vld [vmem:[#allocation19 + $0x18] sm:$0xff]  ;;  %v2385_v41 = vld [vmem:[#allocation19 + $0x10] sm:$0xff]  ;;  %v2383_v45 = vld [vmem:[#allocation19] sm:$0xff] }
  0xf1   : > { %v1178_v9 = vperm.slane %v1170_v4, 0  ;;  %v1179_v10 = vperm.slane %v1171_v5, 0  ;;  %v1180_v24 = vperm.slane %v1172_v20, 0  ;;  %v1181_v25 = vperm.slane %v1173_v21, 0 }
  0xf2   : > { %v1191_v47 = vsub.f32 %v1175_v43, %v3366_v37  ;;  %v1198_v48 = vmax.f32 %v1190_v44, 0.0  ;;  %v1192_v57 = vsub.f32 %v1176_v52, %v3366_v37  ;;  %v1193_v58 = vsub.f32 %v1177_v53, %v3366_v37  ;;  %v2384_v43 = vld [vmem:[#allocation19 + $0x8] sm:$0xff] }
  0xf3   : > { %v1194_v14 = vsub.f32 %v1178_v9, %v3366_v37  ;;  %v1195_v15 = vsub.f32 %v1179_v10, %v3366_v37  ;;  %v1196_v27 = vsub.f32 %v1180_v24, %v3366_v37  ;;  %v1197_v28 = vsub.f32 %v1181_v25, %v3366_v37  ;;  %v2389_v37 = vld [vmem:[#allocation19 + $0x30] sm:$0xff] }
  0xf4   : > { %v1199_v50 = vmax.f32 %v1191_v47, 0.0  ;;  %v1206_v51 = vpack.c.bf16 %v1198_v48, %v1198_v48  ;;  %v1200_v62 = vmax.f32 %v1192_v57, 0.0  ;;  %v1201_v63 = vmax.f32 %v1193_v58, 0.0  ;;  %1485 = vmatpush.bf16.msrb.mxu3 %v2389_v37 }
  0xf5   : > { %v1202_v16 = vmax.f32 %v1194_v14, 0.0  ;;  %v1203_v17 = vmax.f32 %v1195_v15, 0.0  ;;  %v1204_v29 = vmax.f32 %v1196_v27, 0.0  ;;  %v1205_v30 = vmax.f32 %v1197_v28, 0.0 }
  0xf6   : > { %v1207_v54 = vpack.c.bf16 %v1199_v50, %v1199_v50  ;;  %v1228_v55 = vunpack.c.l.b16 %v1206_v51  ;;  %v883_v61 = vpop.f32.mrf.mxu0  ;;  %v1208_v2 = vpack.c.bf16 %v1200_v62, %v1200_v62  ;;  %v1209_v3 = vpack.c.bf16 %v1201_v63, %v1201_v63 }
  0xf7   : > { %v884_v0 = vadd.f32 %v2565_v59, %v883_v61  ;;  %v1210_v18 = vpack.c.bf16 %v1202_v16, %v1202_v16  ;;  %v1211_v19 = vpack.c.bf16 %v1203_v17, %v1203_v17  ;;  %v1212_v31 = vpack.c.bf16 %v1204_v29, %v1204_v29 }
  0xf8   : > { %v1229_v56 = vunpack.c.l.b16 %v1207_v54  ;;  %v1230_v7 = vunpack.c.l.b16 %v1208_v2  ;;  %v1231_v8 = vunpack.c.l.b16 %v1209_v3  ;;  %v1213_v32 = vpack.c.bf16 %v1205_v30, %v1205_v30  ;;  %1486 = vmatpush.bf16.msrb.mxu3 %v2388_v38 }
  0xf9   : > { %v887_v1 = vpack.c.bf16 %v884_v0, %v884_v0  ;;  %v1232_v22 = vunpack.c.l.b16 %v1210_v18  ;;  %v1233_v23 = vunpack.c.l.b16 %v1211_v19  ;;  %v1234_v33 = vunpack.c.l.b16 %v1212_v31 }
  0xfa   : > { %v1236_v60 = vpack.c.b16 %v1229_v56, %v1228_v55  ;;  %v1237_v13 = vpack.c.b16 %v1231_v8, %v1230_v7  ;;  %v1235_v34 = vunpack.c.l.b16 %v1213_v32 }
  0xfb   : > { %888 = vst [vmem:[#allocation2] sm:$0xf] %v887_v1  ;;  %v1238_v26 = vpack.c.b16 %v1233_v23, %v1232_v22 }
  0xfc   : > { %2269 = vmatmul.msk.bf16.vlgmr.msrb.gmra.mxu0 %vm918_vm2, %v1236_v60  ;;  %v1239_v35 = vpack.c.b16 %v1235_v34, %v1234_v33  ;;  %1487 = vmatpush.bf16.msrb.mxu3 %v2387_v39 }
  0xfe   : > { %v885_v6 = vpop.f32.mrf.mxu0 }
 0x100   : > { %1488 = vmatpush.bf16.msrb.mxu3 %v2386_v40 }
 0x102   : > { %v924_v11 = vld [vmem:[#allocation2] sm:$0xf] }
 0x103   : > { %v1010_v12 = vld [vmem:[#allocation2] sm:$0xf]  ;;  %997 = vmatmul.bf16.vlgmr.msra.gmra.mxu2 %v924_v11 }
 0x104   : > { %1084 = vmatmul.bf16.vlgmr.msra.gmra.mxu1 %v1010_v12  ;;  %1489 = vmatpush.bf16.msrb.mxu3 %v2385_v41 }
 0x108   : > { %1490 = vmatpush.bf16.msrb.mxu3 %v2384_v43 }
 0x10c   : > { %2270 = vmatmul.msk.bf16.gmra.mxu0 %vm918_vm2, %v1237_v13  ;;  %1491 = vmatpush.bf16.msrb.mxu3 %v2383_v45 }
 0x113   : > { %2277 = vmatmul.msk.bf16.vlgmr.msrb.gmra.mxu2 %vm918_vm2, %v1236_v60  ;;  %v2567_v60 = vld [vmem:[%s3608_s20] ss:$0 sm:$0xff]  ;;  %s792_s20 = scalar_lea.vmem [#allocation22], %s2121_s15 }
 0x114   : > { %1161 = vmatmul.bf16.vlgmr.msrb.gmra.mxu1 %v1010_v12  ;;  %s1898_s22 = sshll.u32 %s792_s20, 4  ;;  %s1899_s22 = int_to_ptr.vmem [resolvable:$true] %s1898_s22 }
 0x11c   : > { %2271 = vmatmul.msk.bf16.gmra.mxu0 %vm918_vm2, %v1238_v26 }
 0x123   : > { %2278 = vmatmul.msk.bf16.gmra.mxu2 %vm918_vm2, %v1237_v13 }
 0x12c   : > { %2272 = vmatmul.msk.bf16.gmra.mxu0 %vm918_vm2, %v1239_v35 }
 0x133   : > { %2279 = vmatmul.msk.bf16.gmra.mxu2 %vm918_vm2, %v1238_v26 }
 0x143   : > { %2280 = vmatmul.msk.bf16.gmra.mxu2 %vm918_vm2, %v1239_v35 }
 0x181   : > { %v3385_v42 = vpop.f32.mrf.mxu1 }
 0x186   : > { %v998_v44 = vpop.f32.mrf.mxu2 }
 0x187   : > { %v1293_v47 = vrot.slane %v998_v44, 6  ;;  %v1294_v48 = vrot.slane %v998_v44, 7  ;;  %v1295_v55 = vperm.slane %v998_v44, 0  ;;  %v1288_v57 = vrot.slane %v998_v44, 1 }
 0x188   : > { %v1289_v1 = vrot.slane %v998_v44, 2  ;;  %v1290_v11 = vrot.slane %v998_v44, 3  ;;  %v1291_v20 = vrot.slane %v998_v44, 4  ;;  %v1292_v30 = vrot.slane %v998_v44, 5 }
 0x189   : > { %v1087_v46 = vpop.f32.mrf.mxu1  ;;  %v3387_v49 = vperm.slane %v1293_v47, 0  ;;  %v3389_v50 = vperm.slane %v1294_v48, 0  ;;  %v1311_v56 = vsub.f32 %v1295_v55, %v3385_v42  ;;  %v1296_v62 = vperm.slane %v1288_v57, 0 }
 0x18a   : > { %v1297_v6 = vperm.slane %v1289_v1, 0  ;;  %v1298_v17 = vperm.slane %v1290_v11, 0  ;;  %v1299_v25 = vperm.slane %v1291_v20, 0  ;;  %v1300_v36 = vperm.slane %v1292_v30, 0 }
 0x18b   : > { %v1317_v51 = vsub.f32 %v3387_v49, %v3385_v42  ;;  %v1318_v52 = vsub.f32 %v3389_v50, %v3385_v42  ;;  %v1312_v0 = vsub.f32 %v1296_v62, %v3385_v42 }
 0x18c   : > { %v1313_v10 = vsub.f32 %v1297_v6, %v3385_v42  ;;  %v1314_v19 = vsub.f32 %v1298_v17, %v3385_v42  ;;  %v1315_v29 = vsub.f32 %v1299_v25, %v3385_v42  ;;  %v1316_v38 = vsub.f32 %v1300_v36, %v3385_v42 }
 0x18e   : > { %v1000_v53 = vpop.f32.mrf.mxu2 }
 0x191   : > { %v3395_v54 = vpop.f32.mrf.mxu1 }
 0x196   : > { %v1336_v58 = vpop.f32.mrf.mxu2 }
 0x197   : > { %v1356_v59 = vadd.f32 %v1336_v58, %v1311_v56 }
 0x199   : > { %v1164_v61 = vpop.f32.mrf.mxu1  ;;  %v1368_v63 = vadd.f32 %v2567_v60, %v1356_v59 }
 0x19b   : > { %v1376_v3 = vmax.f32 %v1368_v63, 0.0 }
 0x19d   : > { %v1384_v7 = vpack.c.bf16 %v1376_v3, %v1376_v3 }
 0x19e   : > { %v1338_v2 = vpop.f32.mrf.mxu2 }
 0x19f   : > { %v1357_v4 = vadd.f32 %v1338_v2, %v1312_v0  ;;  %v1420_v13 = vunpack.c.l.b16 %v1384_v7 }
 0x1a1   : > { %v1369_v5 = vadd.f32 %v2567_v60, %v1357_v4  ;;  %v3412_v4 = vld [vmem:[%s3609_s26] ss:$0 sm:$0xff]  ;;  %s2962_s26 = sshra.s32 %s1901_s12, 4  ;;  %s2963_s26 = int_to_ptr.hbm [resolvable:$true] %s2962_s26 }
 0x1a2   : > { %s2964_s25 = scalar_lea.hbm %s2963_s26, 8  ;;  %p2969_p10 = scmp.lt.s32.totalorder %s2963_s26, %s3611_s24 }
 0x1a3   : > { %v1377_v8 = vmax.f32 %v1369_v5, 0.0  ;;  %p2965_p1 = scmp.ne.s32.totalorder %s2963_s26, %s2964_s25  ;;  %p2970_p12 = scmp.lt.s32.totalorder %s2968_s4, %s2964_s25 }
 0x1a5   : > { %v1385_v9 = vpack.c.bf16 %v1377_v8, %v1377_v8  ;;  %p2966_p8 = pnand %p2965_p1, %p3299_p0  ;;  %p2971_p13 = por %p2970_p12, %p2969_p10 }
 0x1a6   : > { %v1341_v12 = vpop.f32.mrf.mxu2 }
 0x1a7   : > { %v1421_v14 = vunpack.c.l.b16 %v1385_v9  ;;  %v1358_v15 = vadd.f32 %v1341_v12, %v1313_v10  ;;  %p2967_p9 = pneg %p2966_p8 }
 0x1a9   : > { %v1428_v16 = vpack.c.b16 %v1421_v14, %v1420_v13  ;;  %v1370_v18 = vadd.f32 %v2567_v60, %v1358_v15  ;;  %p2972_p2 = pnand %p2971_p13, %p2967_p9 }
 0x1ab   : > { %1492 = vmatmul.bf16.vlgmr.msrb.gmra.mxu3 %v1428_v16  ;;  %v1378_v22 = vmax.f32 %v1370_v18, 0.0 }
 0x1ad   : > { %v1386_v26 = vpack.c.bf16 %v1378_v22, %v1378_v22 }
 0x1ae   : > { %v1343_v21 = vpop.f32.mrf.mxu2 }
 0x1af   : > { %v1359_v23 = vadd.f32 %v1343_v21, %v1314_v19  ;;  %v1422_v33 = vunpack.c.l.b16 %v1386_v26 }
 0x1b1   : > { %v1371_v24 = vadd.f32 %v2567_v60, %v1359_v23 }
 0x1b3   : > { %v1379_v27 = vmax.f32 %v1371_v24, 0.0 }
 0x1b5   : > { %v1387_v28 = vpack.c.bf16 %v1379_v27, %v1379_v27 }
 0x1b6   : > { %v1346_v31 = vpop.f32.mrf.mxu2 }
 0x1b7   : > { %v1360_v32 = vadd.f32 %v1346_v31, %v1315_v29  ;;  %v1423_v34 = vunpack.c.l.b16 %v1387_v28 }
 0x1b9   : > { %v1429_v35 = vpack.c.b16 %v1423_v34, %v1422_v33  ;;  %v1372_v37 = vadd.f32 %v2567_v60, %v1360_v32 }
 0x1bb   : > { %1497 = vmatmul.bf16.gmra.mxu3 %v1429_v35  ;;  %v1380_v40 = vmax.f32 %v1372_v37, 0.0 }
 0x1bd   : > { %v1388_v45 = vpack.c.bf16 %v1380_v40, %v1380_v40 }
 0x1be   : > { %v1348_v39 = vpop.f32.mrf.mxu2 }
 0x1bf   : > { %v1361_v41 = vadd.f32 %v1348_v39, %v1316_v38  ;;  %v1424_v44 = vunpack.c.l.b16 %v1388_v45 }
 0x1c1   : > { %v1373_v43 = vadd.f32 %v2567_v60, %v1361_v41 }
 0x1c3   : > { %v1381_v46 = vmax.f32 %v1373_v43, 0.0 }
 0x1c5   : > { %v1389_v47 = vpack.c.bf16 %v1381_v46, %v1381_v46 }
 0x1c6   : > { %v1351_v48 = vpop.f32.mrf.mxu2 }
 0x1c7   : > { %v1362_v49 = vadd.f32 %v1351_v48, %v1317_v51  ;;  %v1425_v53 = vunpack.c.l.b16 %v1389_v47  ;;  %v1267_v51 = vpop.f32.mrf.mxu0 }
 0x1c9   : > { %v1430_v55 = vpack.c.b16 %v1425_v53, %v1424_v44  ;;  %v1374_v56 = vadd.f32 %v2567_v60, %v1362_v49 }
 0x1cb   : > { %1502 = vmatmul.bf16.gmra.mxu3 %v1430_v55  ;;  %v1382_v58 = vmax.f32 %v1374_v56, 0.0  ;;  %v3430_v55 = vld [vmem:[#allocation18] ss:$0 sm:$0xff] }
 0x1cd   : > { %v1390_v62 = vpack.c.bf16 %v1382_v58, %v1382_v58 }
 0x1ce   : > { %v1353_v57 = vpop.f32.mrf.mxu2 }
 0x1cf   : > { %v1363_v59 = vadd.f32 %v1353_v57, %v1318_v52  ;;  %v1426_v1 = vunpack.c.l.b16 %v1390_v62  ;;  %v3414_v5 = vpop.f32.mrf.mxu0 }
 0x1d1   : > { %v1375_v61 = vadd.f32 %v2567_v60, %v1363_v59 }
 0x1d3   : > { %v1383_v63 = vmax.f32 %v1375_v61, 0.0 }
 0x1d5   : > { %v1391_v0 = vpack.c.bf16 %v1383_v63, %v1383_v63 }
 0x1d7   : > { %v1427_v2 = vunpack.c.l.b16 %v1391_v0  ;;  %v3417_v8 = vpop.f32.mrf.mxu0 }
 0x1d9   : > { %v1431_v3 = vpack.c.b16 %v1427_v2, %v1426_v1  ;;  %v1268_v2 = vadd.f32 %v3430_v55, %v1267_v51 }
 0x1db   : > { %1507 = vmatmul.bf16.gmra.mxu3 %v1431_v3 }
 0x1df   : > { %v3421_v15 = vpop.f32.mrf.mxu0 }
 0x1e7   : > { %v3424_v28 = vpop.f32.mrf.mxu0 }
 0x1ef   : > { %v1279_v43 = vpop.f32.mrf.mxu0 }
 0x22e   : > { %v1493_v6 = vpop.f32.mrf.mxu3 }
 0x22f   : > { %v1494_v42 = vadd.f32 %v3412_v4, %v1493_v6 }
 0x231   : > { %v1521_v50 = vrot.slane %v1494_v42, 4 }
 0x233   : > { %v1522_v52 = vmax.f32 %v1494_v42, %v1521_v50  ;;  %v1513_v50 = vadd.f32 %v1268_v2, %v3395_v54 }
 0x235   : > { %v1523_v60 = vrot.slane %v1522_v52, 2 }
 0x236   : > { %v1495_v7 = vpop.f32.mrf.mxu3 }
 0x237   : > { %v1524_v9 = vmax.f32 %v1522_v52, %v1523_v60  ;;  %v1496_v10 = vadd.f32 %v3412_v4, %v1495_v7 }
 0x239   : > { %v1525_v11 = vrot.slane %v1524_v9, 1  ;;  %v1527_v12 = vrot.slane %v1496_v10, 4 }
 0x23b   : > { %v1526_v16 = vmax.f32 %v1524_v9, %v1525_v11  ;;  %v1528_v17 = vmax.f32 %v1496_v10, %v1527_v12  ;;  %v1282_v9 = vpop.f32.mrf.mxu0 }
 0x23d   : > { %v1593_v19 = vsub.f32 %v1494_v42, %v1526_v16  ;;  %v1529_v20 = vrot.slane %v1528_v17, 2  ;;  %v1569_v63 = vsub.f32 -inf, %v1526_v16 }
 0x23e   : > { %v1498_v13 = vpop.f32.mrf.mxu3 }
 0x23f   : > { %v1499_v14 = vadd.f32 %v3412_v4, %v1498_v13  ;;  %v1601_v24 = vmul.f32 1.442695, %v1593_v19  ;;  %v1530_v25 = vmax.f32 %v1528_v17, %v1529_v20  ;;  %v1270_v17 = vadd.f32 %v3430_v55, %v3414_v5 }
 0x240   : > { %v1278_v5 = vadd.f32 %v3430_v55, %v3424_v28 }
 0x241   : > { %v1533_v18 = vrot.slane %v1499_v14, 4  ;;  %2570 = vpow2.f32 %v1601_v24  ;;  %v1531_v30 = vrot.slane %v1530_v25, 1  ;;  %v1273_v24 = vadd.f32 %v3430_v55, %v3417_v8 }
 0x242   : > { %v1275_v8 = vadd.f32 %v3430_v55, %v3421_v15  ;;  %v2397_v15 = vld [vmem:[#allocation21 + $0x30] sm:$0xff] }
 0x243   : > { %v1534_v22 = vmax.f32 %v1499_v14, %v1533_v18  ;;  %v1532_v36 = vmax.f32 %v1530_v25, %v1531_v30  ;;  %v1514_v25 = vadd.f32 %v1270_v17, %v3395_v54  ;;  %v1515_v28 = vadd.f32 %v1273_v24, %v3395_v54 }
 0x245   : > { %v1535_v27 = vrot.slane %v1534_v22, 2  ;;  %v1594_v45 = vsub.f32 %v1496_v10, %v1532_v36  ;;  %v1577_v10 = vmul.f32 1.442695, %v1569_v63  ;;  %v1570_v11 = vsub.f32 -inf, %v1532_v36 }
 0x246   : > { %v1500_v21 = vpop.f32.mrf.mxu3 }
 0x247   : > { %v1501_v23 = vadd.f32 %v3412_v4, %v1500_v21  ;;  %v1536_v33 = vmax.f32 %v1534_v22, %v1535_v27  ;;  %v2571_v39 = vpop.eup %2570  ;;  %v1603_v57 = vmul.f32 1.442695, %v1594_v45  ;;  %v1579_v21 = vmul.f32 1.442695, %v1570_v11  ;;  %v1284_v45 = vpop.f32.mrf.mxu0 }
 0x248   : > { %v1625_v48 = vrot.slane %v2571_v39, 4  ;;  %v1681_v13 = vmul.f32 %v2571_v39, %v1513_v50  ;;  %v1280_v27 = vadd.f32 %v3430_v55, %v1279_v43  ;;  %v3462_v43 = vadd.f32 %v1278_v5, %v3395_v54 }
 0x249   : > { %v1539_v26 = vrot.slane %v1501_v23, 4  ;;  %v1537_v38 = vrot.slane %v1536_v33, 1  ;;  %2572 = vpow2.f32 %v1603_v57 }
 0x24a   : > { %v1626_v61 = vadd.f32 %v2571_v39, %v1625_v48 }
 0x24b   : > { %v1540_v29 = vmax.f32 %v1501_v23, %v1539_v26  ;;  %v3427_v49 = vmax.f32 %v1536_v33, %v1537_v38  ;;  %v1689_v26 = vrot.slane %v1681_v13, 4 }
 0x24c   : > { %v1627_v52 = vrot.slane %v1626_v61, 2 }
 0x24d   : > { %v1541_v31 = vrot.slane %v1540_v29, 2  ;;  %v1595_v62 = vsub.f32 %v1499_v14, %v3427_v49  ;;  %v1690_v38 = vadd.f32 %v1689_v26, %v1681_v13 }
 0x24e   : > { %v1503_v32 = vpop.f32.mrf.mxu3  ;;  %v1628_v18 = vadd.f32 %v1627_v52, %v1626_v61 }
 0x24f   : > { %v1504_v34 = vadd.f32 %v3412_v4, %v1503_v32  ;;  %v1542_v35 = vmax.f32 %v1540_v29, %v1541_v31  ;;  %v1605_v60 = vmul.f32 1.442695, %v1595_v62  ;;  %v2573_v20 = vpop.eup %2572  ;;  %v2398_v31 = vld [vmem:[#allocation21 + $0x38] sm:$0xff] }
 0x250   : > { %v1629_v32 = vrot.slane %v1628_v18, 1  ;;  %v1631_v33 = vrot.slane %v2573_v20, 4  ;;  %1869 = vmatpush.bf16.msra.mxu1 %v2398_v31 }
 0x251   : > { %v1545_v37 = vrot.slane %v1504_v34, 4  ;;  %v1543_v41 = vrot.slane %v1542_v35, 1  ;;  %2574 = vpow2.f32 %v1605_v60 }
 0x252   : > { %2576 = vpow2.f32 %v1577_v10  ;;  %v1632_v57 = vadd.f32 %v2573_v20, %v1631_v33 }
 0x253   : > { %v1546_v40 = vmax.f32 %v1504_v34, %v1545_v37  ;;  %v3432_v56 = vmax.f32 %v1542_v35, %v1543_v41  ;;  %v1516_v41 = vadd.f32 %v1275_v8, %v3395_v54 }
 0x254   : > { %1870 = vmatpush.bf16.msra.mxu1 %v2397_v15  ;;  %v1633_v10 = vrot.slane %v1632_v57, 2 }
 0x255   : > { %v1547_v46 = vrot.slane %v1546_v40, 2  ;;  %v1596_v3 = vsub.f32 %v1501_v23, %v3432_v56 }
 0x256   : > { %v1505_v47 = vpop.f32.mrf.mxu3 }
 0x257   : > { %v1548_v44 = vmax.f32 %v1546_v40, %v1547_v46  ;;  %v1506_v53 = vadd.f32 %v3412_v4, %v1505_v47  ;;  %v1607_v14 = vmul.f32 1.442695, %v1596_v3  ;;  %v2575_v37 = vpop.eup %2574  ;;  %v1571_v46 = vsub.f32 -inf, %v3427_v49 }
 0x258   : > { %v2577_v40 = vpop.eup %2576  ;;  %v1285_v49 = vadd.f32 %v3430_v55, %v1284_v45  ;;  %v1691_v3 = vrot.slane %v1690_v38, 2 }
 0x259   : > { %v1549_v58 = vrot.slane %v1548_v44, 1  ;;  %v1551_v59 = vrot.slane %v1506_v53, 4  ;;  %2578 = vpow2.f32 %v1607_v14  ;;  %v3473_v2 = vmul.f32 0.0, %v2577_v40 }
 0x25a   : > { %v3484_v17 = vadd.f32 %v1285_v49, %v3395_v54 }
 0x25b   : > { %v3435_v0 = vmax.f32 %v1548_v44, %v1549_v58  ;;  %v1552_v1 = vmax.f32 %v1506_v53, %v1551_v59  ;;  %v3466_v44 = vadd.f32 %v1280_v27, %v3395_v54  ;;  %v1637_v59 = vrot.slane %v2575_v37, 4 }
 0x25d   : > { %v1553_v6 = vrot.slane %v1552_v1, 2  ;;  %v1597_v7 = vsub.f32 %v1504_v34, %v3435_v0  ;;  %v1682_v34 = vmul.f32 %v2573_v20, %v1514_v25  ;;  %v1638_v13 = vadd.f32 %v2575_v37, %v1637_v59  ;;  %v2395_v25 = vld [vmem:[#allocation21 + $0x20] sm:$0xff] }
 0x25e   : > { %v1508_v42 = vpop.f32.mrf.mxu3 }
 0x25f   : > { %v1554_v12 = vmax.f32 %v1552_v1, %v1553_v6  ;;  %v3442_v16 = vadd.f32 %v3412_v4, %v1508_v42  ;;  %v1609_v19 = vmul.f32 1.442695, %v1597_v7  ;;  %v2579_v48 = vpop.eup %2578  ;;  %v1695_v58 = vrot.slane %v1682_v34, 4  ;;  %v2396_v7 = vld [vmem:[#allocation21 + $0x28] sm:$0xff] }
 0x260   : > { %v1283_v1 = vadd.f32 %v3430_v55, %v1282_v9  ;;  %v1581_v42 = vmul.f32 1.442695, %v1571_v46  ;;  %v1643_v50 = vrot.slane %v2579_v48, 4  ;;  %1871 = vmatpush.bf16.msra.mxu1 %v2396_v7 }
 0x261   : > { %v1555_v51 = vrot.slane %v1554_v12, 1  ;;  %v1557_v23 = vrot.slane %v3442_v16, 4  ;;  %2580 = vpow2.f32 %v1609_v19  ;;  %v1696_v11 = vadd.f32 %v1695_v58, %v1682_v34 }
 0x262   : > { %2582 = vpow2.f32 %v1579_v21  ;;  %v1572_v19 = vsub.f32 -inf, %v3432_v56  ;;  %v3489_v21 = vadd.f32 %v1691_v3, %v1690_v38  ;;  %v1573_v56 = vsub.f32 -inf, %v3435_v0  ;;  %v2393_v0 = vld [vmem:[#allocation21 + $0x10] sm:$0xff] }
 0x263   : > { %v3446_v22 = vmax.f32 %v1554_v12, %v1555_v51  ;;  %v1558_v30 = vmax.f32 %v3442_v16, %v1557_v23  ;;  %v1683_v12 = vmul.f32 %v2575_v37, %v1515_v28  ;;  %v1519_v51 = vadd.f32 %v1283_v1, %v3395_v54 }
 0x264   : > { %v1644_v23 = vadd.f32 %v2579_v48, %v1643_v50  ;;  %v1697_v27 = vrot.slane %v1696_v11, 2  ;;  %1872 = vmatpush.bf16.msra.mxu1 %v2395_v25  ;;  %v1583_v31 = vmul.f32 1.442695, %v1572_v19 }
 0x265   : > { %v1598_v29 = vsub.f32 %v1506_v53, %v3446_v22  ;;  %v1559_v36 = vrot.slane %v1558_v30, 2  ;;  %v1630_v53 = vadd.f32 %v1629_v32, %v1628_v18  ;;  %v1701_v26 = vrot.slane %v1683_v12, 4 }
 0x266   : > { %v1510_v39 = vpop.f32.mrf.mxu3  ;;  %v1684_v32 = vmul.f32 %v2579_v48, %v1516_v41  ;;  %v1645_v34 = vrot.slane %v1644_v23, 2  ;;  %v1574_v8 = vsub.f32 -inf, %v3446_v22  ;;  %v3498_v22 = vadd.f32 %v1697_v27, %v1696_v11 }
 0x267   : > { %v1611_v35 = vmul.f32 1.442695, %v1598_v29  ;;  %v1560_v47 = vmax.f32 %v1558_v30, %v1559_v36  ;;  %v3469_v62 = vadd.f32 %v3412_v4, %v1510_v39  ;;  %v2581_v63 = vpop.eup %2580  ;;  %v1673_v4 = vadd.f32 %v1630_v53, %v3473_v2  ;;  %v2394_v36 = vld [vmem:[#allocation21 + $0x18] sm:$0xff] }
 0x268   : > { %v2583_v6 = vpop.eup %2582  ;;  %v1649_v9 = vrot.slane %v2581_v63, 4  ;;  %v1639_v29 = vrot.slane %v1638_v13, 2  ;;  %v1702_v28 = vadd.f32 %v1701_v26, %v1683_v12  ;;  %v1685_v38 = vmul.f32 %v2581_v63, %v3462_v43  ;;  %1873 = vmatpush.bf16.msra.mxu1 %v2394_v36 }
 0x269   : > { %2584 = vpow2.f32 %v1611_v35  ;;  %v1561_v61 = vrot.slane %v1560_v47, 1  ;;  %v1563_v60 = vrot.slane %v3469_v62, 4  ;;  %v3486_v18 = vmul.f32 0.0, %v2583_v6 }
 0x26a   : > { %2586 = vpow2.f32 %v1581_v42  ;;  %v1650_v30 = vadd.f32 %v2581_v63, %v1649_v9  ;;  %v1640_v45 = vadd.f32 %v1639_v29, %v1638_v13  ;;  %v1585_v48 = vmul.f32 1.442695, %v1573_v56 }
 0x26b   : > { %v3475_v52 = vmax.f32 %v1560_v47, %v1561_v61  ;;  %v1564_v14 = vmax.f32 %v3469_v62, %v1563_v60  ;;  %2588 = vrcp.f32 %v1673_v4  ;;  %v1707_v58 = vrot.slane %v1684_v32, 4 }
 0x26c   : > { %v1651_v46 = vrot.slane %v1650_v30, 2  ;;  %v1587_v43 = vmul.f32 1.442695, %v1574_v8  ;;  %v1703_v63 = vrot.slane %v1702_v28, 2  ;;  %v1713_v1 = vrot.slane %v1685_v38, 4  ;;  %1874 = vmatpush.bf16.msra.mxu1 %v2393_v0 }
 0x26d   : > { %v1599_v55 = vsub.f32 %v3442_v16, %v3475_v52  ;;  %v1634_v16 = vadd.f32 %v1633_v10, %v1632_v57  ;;  %v1565_v54 = vrot.slane %v1564_v14, 2  ;;  %v1575_v39 = vsub.f32 -inf, %v3475_v52  ;;  %v2392_v52 = vld [vmem:[#allocation21 + $0x8] sm:$0xff] }
 0x26e   : > { %v1646_v57 = vadd.f32 %v1645_v34, %v1644_v23  ;;  %v1652_v6 = vadd.f32 %v1651_v46, %v1650_v30  ;;  %v1708_v11 = vadd.f32 %v1707_v58, %v1684_v32  ;;  %v1714_v9 = vadd.f32 %v1713_v1, %v1685_v38 }
 0x26f   : > { %v2585_v20 = vpop.eup %2584  ;;  %v1613_v24 = vmul.f32 1.442695, %v1599_v55  ;;  %v1566_v35 = vmax.f32 %v1564_v14, %v1565_v54  ;;  %v1635_v37 = vrot.slane %v1634_v16, 1  ;;  %v1589_v49 = vmul.f32 1.442695, %v1575_v39 }
 0x270   : > { %v1655_v5 = vrot.slane %v2585_v20, 4  ;;  %v2587_v40 = vpop.eup %2586  ;;  %v1686_v41 = vmul.f32 %v2585_v20, %v3466_v44  ;;  %v1641_v44 = vrot.slane %v1640_v45, 1  ;;  %v1647_v10 = vrot.slane %v1646_v57, 1  ;;  %1875 = vmatpush.bf16.msra.mxu1 %v2392_v52 }
 0x271   : > { %2590 = vpow2.f32 %v1613_v24  ;;  %v1567_v47 = vrot.slane %v1566_v35, 1  ;;  %v3496_v15 = vpop.eup %2588  ;;  %v1636_v61 = vadd.f32 %v1635_v37, %v1634_v16  ;;  %v1653_v23 = vrot.slane %v1652_v6, 1  ;;  %v2391_v24 = vld [vmem:[#allocation21] sm:$0xff] }
 0x272   : > { %v1656_v33 = vadd.f32 %v2585_v20, %v1655_v5  ;;  %2592 = vpow2.f32 %v1583_v31  ;;  %v1719_v42 = vrot.slane %v1686_v41, 4  ;;  %v1642_v20 = vadd.f32 %v1641_v44, %v1640_v45 }
 0x273   : > { %v1568_v59 = vmax.f32 %v1566_v35, %v1567_v47  ;;  %2594 = vpow2.f32 %v1585_v48  ;;  %v1674_v19 = vadd.f32 %v1636_v61, %v3486_v18  ;;  %v3502_v25 = vmul.f32 0.0, %v2587_v40 }
 0x274   : > { %v1657_v53 = vrot.slane %v1656_v33, 2  ;;  %2596 = vpow2.f32 %v1587_v43  ;;  %v1704_v5 = vadd.f32 %v1703_v63, %v1702_v28  ;;  %v1709_v27 = vrot.slane %v1708_v11, 2  ;;  %1876 = vmatpush.bf16.msra.mxu1 %v2391_v24 }
 0x275   : > { %v1600_v50 = vsub.f32 %v3469_v62, %v1568_v59  ;;  %2598 = vpow2.f32 %v1589_v49  ;;  %v1720_v62 = vadd.f32 %v1719_v42, %v1686_v41  ;;  %v1576_v29 = vsub.f32 -inf, %v1568_v59 }
 0x276   : > { %v1658_v60 = vadd.f32 %v1657_v53, %v1656_v33  ;;  %v1699_v54 = vrot.slane %v3498_v22, 1  ;;  %v1648_v31 = vadd.f32 %v1647_v10, %v1646_v57  ;;  %v1715_v32 = vrot.slane %v1714_v9, 2 }
 0x277   : > { %v2591_v3 = vpop.eup %2590  ;;  %v1615_v12 = vmul.f32 1.442695, %v1600_v50  ;;  %v1675_v34 = vadd.f32 %v1642_v20, %v3502_v25  ;;  %v1654_v8 = vadd.f32 %v1653_v23, %v1652_v6  ;;  %v1721_v35 = vrot.slane %v1720_v62, 2 }
 0x278   : > { %v1661_v7 = vrot.slane %v2591_v3, 4  ;;  %v1687_v4 = vmul.f32 %v2591_v3, %v1519_v51  ;;  %v2593_v13 = vpop.eup %2592  ;;  %v1659_v16 = vrot.slane %v1658_v60, 1  ;;  %v1705_v40 = vrot.slane %v1704_v5, 1 }
 0x279   : > { %2600 = vpow2.f32 %v1615_v12  ;;  %v2595_v30 = vpop.eup %2594  ;;  %v1620_v37 = vmul.f32 0.0, %v2593_v13  ;;  %v1710_v45 = vadd.f32 %v1709_v27, %v1708_v11  ;;  %v1591_v41 = vmul.f32 1.442695, %v1576_v29 }
 0x27a   : > { %v1662_v55 = vadd.f32 %v2591_v3, %v1661_v7  ;;  %v1725_v14 = vrot.slane %v1687_v4, 4  ;;  %v2597_v33 = vpop.eup %2596  ;;  %2602 = vrcp.f32 %v1674_v19  ;;  %v1660_v38 = vadd.f32 %v1659_v16, %v1658_v60 }
 0x27b   : > { %v2599_v36 = vpop.eup %2598  ;;  %v1621_v46 = vmul.f32 0.0, %v2595_v30  ;;  %v1676_v47 = vadd.f32 %v1648_v31, %v1620_v37  ;;  %v1716_v0 = vadd.f32 %v1715_v32, %v1714_v9  ;;  %v1622_v48 = vmul.f32 0.0, %v2597_v33 }
 0x27c   : > { %v1663_v51 = vrot.slane %v1662_v55, 2  ;;  %v1726_v26 = vadd.f32 %v1725_v14, %v1687_v4  ;;  %2604 = vrcp.f32 %v1675_v34  ;;  %v1722_v43 = vadd.f32 %v1721_v35, %v1720_v62 }
 0x27d   : > { %v1677_v58 = vadd.f32 %v1654_v8, %v1621_v46  ;;  %v1623_v59 = vmul.f32 0.0, %v2599_v36  ;;  %v1678_v61 = vadd.f32 %v1660_v38, %v1622_v48  ;;  %v1693_v44 = vrot.slane %v3489_v21, 1 }
 0x27e   : > { %v1664_v56 = vadd.f32 %v1663_v51, %v1662_v55  ;;  %v1727_v39 = vrot.slane %v1726_v26, 2  ;;  %v1711_v6 = vrot.slane %v1710_v45, 1  ;;  %2606 = vpow2.f32 %v1591_v41 }
 0x27f   : > { %v2601_v57 = vpop.eup %2600  ;;  %2608 = vrcp.f32 %v1676_v47  ;;  %v1717_v50 = vrot.slane %v1716_v0, 1  ;;  %v1700_v7 = vadd.f32 %v1699_v54, %v3498_v22  ;;  %v1706_v4 = vadd.f32 %v1705_v40, %v1704_v5 }
 0x280   : > { %v1665_v28 = vrot.slane %v1664_v56, 1  ;;  %v1728_v63 = vadd.f32 %v1727_v39, %v1726_v26  ;;  %v1667_v1 = vrot.slane %v2601_v57, 4  ;;  %v1688_v49 = vmul.f32 %v2601_v57, %v3484_v17  ;;  %v2603_v3 = vpop.eup %2602 }
 0x281   : > { %2610 = vrcp.f32 %v1677_v58  ;;  %v1723_v10 = vrot.slane %v1722_v43, 1  ;;  %v1694_v9 = vadd.f32 %v1693_v44, %v3489_v21  ;;  %v1712_v55 = vadd.f32 %v1711_v6, %v1710_v45 }
 0x282   : > { %v1666_v53 = vadd.f32 %v1665_v28, %v1664_v56  ;;  %v1668_v52 = vadd.f32 %v2601_v57, %v1667_v1  ;;  %v1731_v60 = vrot.slane %v1688_v49, 4  ;;  %2612 = vrcp.f32 %v1678_v61  ;;  %v2605_v17 = vpop.eup %2604 }
 0x283   : > { %v1729_v11 = vrot.slane %v1728_v63, 1  ;;  %v1718_v14 = vadd.f32 %v1717_v50, %v1716_v0  ;;  %v1738_v62 = vadd.f32 %v1700_v7, %v3486_v18  ;;  %v1724_v24 = vadd.f32 %v1723_v10, %v1722_v43 }
 0x284   : > { %v1679_v42 = vadd.f32 %v1666_v53, %v1623_v59  ;;  %v1669_v12 = vrot.slane %v1668_v52, 2  ;;  %v1732_v13 = vadd.f32 %v1731_v60, %v1688_v49  ;;  %v2607_v23 = vpop.eup %2606  ;;  %v1739_v16 = vadd.f32 %v1706_v4, %v3502_v25 }
 0x285   : > { %v2609_v22 = vpop.eup %2608  ;;  %v1730_v51 = vadd.f32 %v1729_v11, %v1728_v63  ;;  %v1737_v29 = vadd.f32 %v1694_v9, %v3473_v2  ;;  %v1754_v30 = vmul.f32 %v2603_v3, %v1738_v62  ;;  %v1740_v21 = vadd.f32 %v1712_v55, %v1620_v37  ;;  %v2569_v11 = vld [vmem:[%s3610_s23] ss:$0 sm:$0xff] }
 0x286   : > { %2614 = vrcp.f32 %v1679_v42  ;;  %v1670_v19 = vadd.f32 %v1669_v12, %v1668_v52  ;;  %v1733_v20 = vrot.slane %v1732_v13, 2  ;;  %v1755_v31 = vmul.f32 %v2605_v17, %v1739_v16  ;;  %v1009_v12 = vld [vmem:[%s3325_s5] sm:$0xff] }
 0x287   : > { %v2611_v27 = vpop.eup %2610  ;;  %v1741_v32 = vadd.f32 %v1718_v14, %v1621_v46  ;;  %v1624_v56 = vmul.f32 0.0, %v2607_v23  ;;  %v1753_v18 = vmul.f32 %v3496_v15, %v1737_v29  ;;  %v1756_v8 = vmul.f32 %v2609_v22, %v1740_v21 }
 0x288   : > { %v1671_v26 = vrot.slane %v1670_v19, 1  ;;  %v1734_v5 = vadd.f32 %v1733_v20, %v1732_v13  ;;  %v2613_v54 = vpop.eup %2612  ;;  %v1742_v35 = vadd.f32 %v1724_v24, %v1622_v48  ;;  %v1743_v38 = vadd.f32 %v1730_v51, %v1623_v59 }
 0x289   : > { %v1757_v25 = vmul.f32 %v2611_v27, %v1741_v32  ;;  %v1762_v39 = vpack.c.bf16 %v1754_v30, %v1754_v30  ;;  %v1763_v45 = vpack.c.bf16 %v1755_v31, %v1755_v31  ;;  %v1761_v37 = vpack.c.bf16 %v1753_v18, %v1753_v18 }
 0x28a   : > { %v1672_v33 = vadd.f32 %v1671_v26, %v1670_v19  ;;  %v1735_v36 = vrot.slane %v1734_v5, 1  ;;  %v1758_v40 = vmul.f32 %v2613_v54, %v1742_v35  ;;  %v1764_v41 = vpack.c.bf16 %v1756_v8, %v1756_v8 }
 0x28b   : > { %v1765_v46 = vpack.c.bf16 %v1757_v25, %v1757_v25  ;;  %v1798_v0 = vunpack.c.l.b16 %v1762_v39  ;;  %v1799_v57 = vunpack.c.l.b16 %v1763_v45  ;;  %v1797_v15 = vunpack.c.l.b16 %v1761_v37 }
 0x28c   : > { %v2615_v34 = vpop.eup %2614  ;;  %v1680_v28 = vadd.f32 %v1672_v33, %v1624_v56  ;;  %v1736_v47 = vadd.f32 %v1735_v36, %v1734_v5  ;;  %v1766_v53 = vpack.c.bf16 %v1758_v40, %v1758_v40  ;;  %v1800_v48 = vunpack.c.l.b16 %v1764_v41 }
 0x28d   : > { %v1759_v2 = vmul.f32 %v2615_v34, %v1743_v38  ;;  %v1801_v61 = vunpack.c.l.b16 %v1765_v46  ;;  %v1806_v49 = vsel %vm1805_vm3, %v1798_v0, %v1797_v15 }
 0x28e   : > { %2616 = vrcp.f32 %v1680_v28  ;;  %v1744_v43 = vadd.f32 %v1736_v47, %v1624_v56  ;;  %v1802_v1 = vunpack.c.l.b16 %v1766_v53  ;;  %v1808_v44 = vsel %vm1807_vm4, %v1799_v57, %v1806_v49 }
 0x28f   : > { %v1767_v58 = vpack.c.bf16 %v1759_v2, %v1759_v2  ;;  %v1810_v42 = vsel %vm1809_vm5, %v1800_v48, %v1808_v44 }
 0x290   : > { %v1812_v50 = vsel %vm1811_vm6, %v1801_v61, %v1810_v42 }
 0x291   : > { %v1803_v3 = vunpack.c.l.b16 %v1767_v58  ;;  %v1814_v60 = vsel %vm1813_vm7, %v1802_v1, %v1812_v50 }
 0x293   : > { %v1816_v7 = vsel %vm1815_vm8, %v1803_v3, %v1814_v60 }
 0x294   : > { %v2617_v59 = vpop.eup %2616 }
 0x295   : > { %v1760_v63 = vmul.f32 %v2617_v59, %v1744_v43 }
 0x297   : > { %v1768_v6 = vpack.c.bf16 %v1760_v63, %v1760_v63 }
 0x299   : > { %v1804_v52 = vunpack.c.l.b16 %v1768_v6 }
 0x29b   : > { %v1818_v4 = vsel %vm1817_vm9, %v1804_v52, %v1816_v7 }
 0x29c   : > { %v1819_v10 = vpack.c.b16 %v1818_v4, %v1818_v4 }
 0x29e   : > { %1877 = vmatmul.bf16.vlgmr.msra.gmra.mxu1 %v1819_v10 }
 0x31b   : > { %v1878_v13 = vpop.f32.mrf.mxu1 }
 0x31c   : > { %v1879_v17 = vadd.f32 %v2569_v11, %v1878_v13 }
 0x31e   : > { %v1882_v9 = vadd.f32 %v1879_v17, %v1009_v12 }
 0x320   : > { %1883 = vst [vmem:[%s792_s20] sm:$0xff] %v1882_v9 }
 0x321   : > { %2975 = shalt.err (!%p2972_p2)
}
 0x322   : > { %2441 = dma.vmem_to_hbm [thread:$0]  (%p3299_p0), %s1899_s22, 128, %s1901_s12, %s1885_s30  }
 0x323   : > { %v1880_v55 = vpop.f32.mrf.mxu1 }
 0x324 PF: > { %s1912_s17 = sand.u32 1, %s3030_s27   ;;  %p2479_p4 = pnand %p2117_p6, %p3306_p5 }
 0x325   : > { %s1913_s3 = scalar_lea.sflag [#allocation6], %s1912_s17 }
 0x326   : > { %p2480_p7 = pneg %p2479_p4 }
 0x328   : > { %3025 = dma.done.wait (%p2480_p7), %s1913_s3, 128  }
 0x329   : > { %3027 = vsyncadd (%p2480_p7), %s1913_s3, 4294967168  ;;  %s39_s19 = sadd.s32 1, %s3050_s19   ;;  %s3612_s27 = smov %s3034_s28 }
 0x32a   : > { %p36_p11 = scmp.ge.s32.totalorder %s39_s19, 4   ;;  %s3613_s28 = smov %s3038_s29 }
 0x32b   : > { %s3614_s29 = smov %s3304_s21  ;;  %s3615_s30 = smov %s3046_s0 }
 0x32c   : > { %s3616_s0 = smov %s3618_s1  ;;  %38 = sbr.rel (!%p36_p11) target bundleno = 25 (0x19), region = 185 }
 0x331   :  { %1919 = vsyncpa [#allocation5], 1 }
 0x332   :  { %1921 = vsyncpa [#allocation5 + $0x1], 1 }
 0x333   :  { %1922 = vsyncpa [#allocation8], 1 }
 0x334   :  { %1923 = vsyncpa [#allocation11], 1 }
 0x335   :  { %1924 = vsyncpa [#allocation14], 1 }
 0x336   :  { %1925 = vsyncpa [#allocation17], 1 }
 0x337   :  { %1926 = vsyncpa [#allocation20], 1 }
 0x338   :  { %1927 = vsyncpa [#allocation6], 1 }
 0x339   :  { %1929 = vsyncpa [#allocation6 + $0x1], 1 }

</bundles_post_ra>
